<compile_context>
chip_gen: v7x
topology: tpu7x:2x2x1
jax: 0.10.0
libtpu: 0.0.40
codegen_flags: <defaults>
</compile_context>

<pallas_src>
import functools

import jax
import jax.numpy as jnp
from jax import lax
from jax.experimental import pallas as pl
from jax.experimental.pallas import tpu as pltpu


# ------------------------------- fused kernel -------------------------------

def _make_fused_kernel(num_layers, hidden_size, seq_len, batch, component_K, out_pad):
    H, T, B, K = hidden_size, seq_len, batch, component_K

    def kernel(*refs):
        idx = 0
        x_ref = refs[idx]; idx += 1            # (T*B, I)   time-major rows
        w_ih0_ref = refs[idx]; idx += 1        # (I, 4H)
        b0_ref = refs[idx]; idx += 1           # (1, 4H)    combined layer-0 bias
        w_hh0_ref = refs[idx]; idx += 1        # (H, 4H)
        upper = []
        for _ in range(num_layers - 1):
            upper.append((refs[idx], refs[idx + 1]))   # (w_cat (2H,4H), b (1,4H))
            idx += 2
        gamma_ref = refs[idx]; idx += 1        # (1, H)
        beta_ref = refs[idx]; idx += 1         # (1, H)
        wfc_ref = refs[idx]; idx += 1          # (H, out_pad)
        bfc_ref = refs[idx]; idx += 1          # (1, out_pad)
        y_ref = refs[idx]; idx += 1            # (T*B, out_pad)  OUTPUT
        hseq_scr = refs[idx]                   # (T*B, H)        scratch

        # ---- layer-0 input projection for ALL timesteps: one batched matmul ----
        xproj = jnp.dot(x_ref[...], w_ih0_ref[...],
                        preferred_element_type=jnp.float32) + b0_ref[...]    # (T*B, 4H)

        # hoist loop-invariant weights out of the recurrence
        w_hh0 = w_hh0_ref[...]
        upper_w = [(w[...], b[...]) for (w, b) in upper]
        # TODO(synk): the loop-invariant W_hh / W_cat could be pinned in MXU weight
        # registers via pltpu.matmul_push_rhs / matmul_acc_lhs once per sequence;
        # kept as jnp.dot for guaranteed lowering.

        def cell(gates, c_prev):
            # Activate the whole (B, 4H) vreg once per nonlinearity, slice gates.
            # TODO(synk): the f/g/o slices sit at lane offsets H/2H/3H and imply
            # XLU lane relayouts on the serial path; could be removed with a
            # roll-based full-lane update or pre-permuted gate columns.
            sg = jax.nn.sigmoid(gates)
            tg = jnp.tanh(gates)
            i_g = sg[:, 0 * H:1 * H]
            f_g = sg[:, 1 * H:2 * H]
            o_g = sg[:, 3 * H:4 * H]
            g_g = tg[:, 2 * H:3 * H]
            c_new = f_g * c_prev + i_g * g_g
            h_new = o_g * jnp.tanh(c_new)
            return h_new, c_new

        zeros = jnp.zeros((B, H), jnp.float32)
        h = [zeros] * num_layers
        c = [zeros] * num_layers

        # Fully unrolled time loop (T static & small): full scheduler visibility.
        # TODO(synk): for long T, switch to a time-chunked "arbitrary" grid with
        # h/c carried in scratch to bound VMEM (matters most on v7x's 64 MiB).
        for t in range(T):
            # layer 0: x projection precomputed; only h @ W_hh is on the serial path
            gates0 = xproj[t * B:(t + 1) * B, :] + jnp.dot(
                h[0], w_hh0, preferred_element_type=jnp.float32)
            h[0], c[0] = cell(gates0, c[0])
            inp = h[0]
            # upper layers: ONE fused [inp, h_prev] @ [W_ih; W_hh] dot per layer
            for l in range(1, num_layers):
                w_cat, b_l = upper_w[l - 1]
                xh = jnp.concatenate([inp, h[l]], axis=1)            # (B, 2H)
                gates = jnp.dot(xh, w_cat,
                                preferred_element_type=jnp.float32) + b_l
                h[l], c[l] = cell(gates, c[l])
                inp = h[l]
            hseq_scr[t * B:(t + 1) * B, :] = inp

        # --------------- head: LayerNorm + fc + MDN, batched over T*B ---------------
        hcat = hseq_scr[...]                                         # (T*B, H)
        mean = jnp.mean(hcat, axis=-1, keepdims=True)
        var = jnp.mean((hcat - mean) ** 2, axis=-1, keepdims=True)
        ln = (hcat - mean) * lax.rsqrt(var + 1e-5)
        ln = ln * gamma_ref[...] + beta_ref[...]

        # fc projection, zero-padded to a lane-dense 128-wide output
        y = jnp.dot(ln, wfc_ref[...],
                    preferred_element_type=jnp.float32) + bfc_ref[...]  # (T*B, out_pad)

        col = lax.broadcasted_iota(jnp.int32, y.shape, 1)
        pi_mask = col < K

        # softmax restricted to the first K columns (exact divide: sum(pi)==1 holds)
        m = jnp.max(jnp.where(pi_mask, y, jnp.float32(-1e30)), axis=-1, keepdims=True)
        e = jnp.where(pi_mask, jnp.exp(y - m), 0.0)
        pi = e / jnp.sum(e, axis=-1, keepdims=True)

        # full-vreg transcendentals, selected per column range
        exp_y = jnp.exp(y)
        tanh_y = jnp.tanh(y)
        sig_y = jax.nn.sigmoid(y)

        out = y                                                     # mu1, mu2 pass through
        out = jnp.where(pi_mask, pi, out)                           # pi
        out = jnp.where((col >= 3 * K) & (col < 5 * K), exp_y, out)   # std1, std2
        out = jnp.where((col >= 5 * K) & (col < 6 * K), tanh_y, out)  # corr
        out = jnp.where(col >= 6 * K, sig_y, out)                     # eos (+pad)
        y_ref[...] = out

    return kernel


# ----------------------------------- wrapper -----------------------------------

def uncondition_lstm_forward(x_btI, params, *, hidden_size, num_layers, component_K):
    """x_btI: (B, T, input_size) float32. Returns the 7 MDN outputs, batch_first."""
    B, T, I = x_btI.shape
    H, K = hidden_size, component_K
    out_size = 6 * K + 1
    out_pad = ((out_size + 127) // 128) * 128      # lane-dense head output width

    lstm_params = params["lstm"]
    w_ih0_t, w_hh0_t, b0 = lstm_params[0]

    # time-major rows so the per-step slice inside the kernel is contiguous
    x_flat = jnp.transpose(x_btI, (1, 0, 2)).reshape(T * B, I)

    inputs = [x_flat, w_ih0_t, b0, w_hh0_t]
    in_specs = [pl.BlockSpec((T * B, I), lambda i: (0, 0)),
                pl.BlockSpec((I, 4 * H), lambda i: (0, 0)),
                pl.BlockSpec((1, 4 * H), lambda i: (0, 0)),
                pl.BlockSpec((H, 4 * H), lambda i: (0, 0))]
    for l in range(1, num_layers):
        w_ih_t, w_hh_t, b = lstm_params[l]
        w_cat = jnp.concatenate([w_ih_t, w_hh_t], axis=0)   # (2H, 4H): [W_ih; W_hh]
        inputs += [w_cat, b]
        in_specs += [pl.BlockSpec((2 * H, 4 * H), lambda i: (0, 0)),
                     pl.BlockSpec((1, 4 * H), lambda i: (0, 0))]

    gamma, beta = params["ln"]
    w_fc_t, b_fc = params["fc"]
    w_fc_pad = jnp.zeros((H, out_pad), jnp.float32).at[:, :out_size].set(w_fc_t)
    b_fc_pad = jnp.zeros((1, out_pad), jnp.float32).at[:, :out_size].set(b_fc)
    inputs += [gamma, beta, w_fc_pad, b_fc_pad]
    in_specs += [pl.BlockSpec((1, H), lambda i: (0, 0)),
                 pl.BlockSpec((1, H), lambda i: (0, 0)),
                 pl.BlockSpec((H, out_pad), lambda i: (0, 0)),
                 pl.BlockSpec((1, out_pad), lambda i: (0, 0))]

    kernel = _make_fused_kernel(num_layers, H, T, B, K, out_pad)
    y_pad = pl.pallas_call(
        kernel,
        out_shape=jax.ShapeDtypeStruct((T * B, out_pad), jnp.float32),
        grid_spec=pltpu.PrefetchScalarGridSpec(
            num_scalar_prefetch=0,
            grid=(1,),   # single invocation; whole problem resident in VMEM (KBs)
            in_specs=in_specs,
            out_specs=pl.BlockSpec((T * B, out_pad), lambda i: (0, 0)),
            scratch_shapes=[pltpu.VMEM((T * B, H), jnp.float32)],   # h sequence
        ),
        compiler_params=pltpu.CompilerParams(
            dimension_semantics=("arbitrary",)),    # sequential recurrence
    )(*inputs)
    # TODO(synk): for larger batch, add a leading "parallel" batch-tile grid axis so
    # v7x's two TensorCores each run an independent batch slab of the recurrence.

    # split the packed lane-dense output back into the 7 MDN tensors (batch_first)
    y = y_pad[:, :out_size].reshape(T, B, out_size).transpose(1, 0, 2)   # (B, T, 6K+1)
    pi = y[..., 0 * K:1 * K]
    mu1 = y[..., 1 * K:2 * K]
    mu2 = y[..., 2 * K:3 * K]
    std1 = y[..., 3 * K:4 * K]
    std2 = y[..., 4 * K:5 * K]
    corr = y[..., 5 * K:6 * K]
    eos_p = y[..., 6 * K:6 * K + 1]
    return pi, mu1, mu2, std1, std2, corr, eos_p


# ----------------- deterministic parameter construction (PyTorch init) -----------------

def _xavier_uniform(key, shape):
    fan_out, fan_in = shape
    bound = jnp.sqrt(6.0 / (fan_in + fan_out))
    return jax.random.uniform(key, shape, jnp.float32, -bound, bound)


def _orthogonal(key, shape):
    rows, cols = shape
    n = max(rows, cols)
    a = jax.random.normal(key, (n, n), jnp.float32)
    q, r = jnp.linalg.qr(a)
    q = q * jnp.sign(jnp.diag(r))[None, :]
    return q[:rows, :cols]


def init_params(key, input_size, hidden_size, num_layers, component_K):
    H = hidden_size
    out_size = 6 * component_K + 1
    params = {"lstm": []}
    for l in range(num_layers):
        in_l = input_size if l == 0 else H
        key, k1, k2 = jax.random.split(key, 3)
        w_ih = _xavier_uniform(k1, (4 * H, in_l))   # PyTorch layout (4H, in)
        w_hh = _orthogonal(k2, (4 * H, H))
        # PyTorch _initialize_weights sets the [H:2H] (forget-gate) segment of BOTH
        # bias_ih and bias_hh to 1.0; the kernel uses the combined bias, hence 2.0.
        b = jnp.zeros((4 * H,), jnp.float32).at[H:2 * H].set(2.0)
        params["lstm"].append((w_ih.T, w_hh.T, b.reshape(1, 4 * H)))
    gamma = jnp.ones((1, H), jnp.float32)
    beta = jnp.zeros((1, H), jnp.float32)
    key, kf = jax.random.split(key)
    w_fc = _xavier_uniform(kf, (out_size, H))
    b_fc = jnp.zeros((1, out_size), jnp.float32)
    params["ln"] = (gamma, beta)
    params["fc"] = (w_fc.T, b_fc)
    return params


# ----------------------------- pure-JAX reference -----------------------------

def _reference_forward(x, params, *, hidden_size, num_layers, component_K):
    B, T, _ = x.shape
    H, K = hidden_size, component_K
    h = [jnp.zeros((B, H), jnp.float32) for _ in range(num_layers)]
    c = [jnp.zeros((B, H), jnp.float32) for _ in range(num_layers)]
    hs = []
    for t in range(T):
        inp = x[:, t, :]
        for l in range(num_layers):
            w_ih_t, w_hh_t, b = params["lstm"][l]
            g = inp @ w_ih_t + h[l] @ w_hh_t + b
            i_g = jax.nn.sigmoid(g[:, 0 * H:1 * H])
            f_g = jax.nn.sigmoid(g[:, 1 * H:2 * H])
            g_g = jnp.tanh(g[:, 2 * H:3 * H])
            o_g = jax.nn.sigmoid(g[:, 3 * H:4 * H])
            c[l] = f_g * c[l] + i_g * g_g
            h[l] = o_g * jnp.tanh(c[l])
            inp = h[l]
        hs.append(inp)
    hseq = jnp.stack(hs, axis=1)                     # (B, T, H)
    gamma, beta = params["ln"]
    mean = hseq.mean(-1, keepdims=True)
    var = ((hseq - mean) ** 2).mean(-1, keepdims=True)
    ln = (hseq - mean) / jnp.sqrt(var + 1e-5) * gamma + beta
    w_fc_t, b_fc = params["fc"]
    y = ln @ w_fc_t + b_fc
    pi = jax.nn.softmax(y[..., 0 * K:1 * K], axis=-1)
    mu1 = y[..., 1 * K:2 * K]
    mu2 = y[..., 2 * K:3 * K]
    std1 = jnp.exp(y[..., 3 * K:4 * K])
    std2 = jnp.exp(y[..., 4 * K:5 * K])
    corr = jnp.tanh(y[..., 5 * K:6 * K])
    eos_p = jax.nn.sigmoid(y[..., 6 * K:6 * K + 1])
    return pi, mu1, mu2, std1, std2, corr, eos_p


if __name__ == "__main__":
    # shapes implied by the module: input_size=3 (pen strokes), hidden=32,
    # num_layers=2, component_K=5 -> output_size=31
    B, T, I = 2, 8, 3
    H, L, K = 32, 2, 5

    key = jax.random.PRNGKey(0)
    key, kx = jax.random.split(key)
    x = jax.random.normal(kx, (B, T, I), jnp.float32)
    params = init_params(key, I, H, L, K)

    fwd = jax.jit(functools.partial(
        uncondition_lstm_forward, hidden_size=H, num_layers=L, component_K=K))
    outs = fwd(x, params)
    jax.block_until_ready(outs)
    pi, mu1, mu2, std1, std2, corr, eos_p = outs

    assert pi.shape == (B, T, K) and eos_p.shape == (B, T, 1)
    assert all(bool(jnp.all(jnp.isfinite(o))) for o in outs)
    assert bool(jnp.allclose(jnp.sum(pi, axis=-1), 1.0, atol=1e-5))

    # check against a pure-JAX reference of the PyTorch forward semantics
    refs = _reference_forward(x, params, hidden_size=H, num_layers=L, component_K=K)
    for got, want in zip(outs, refs):
        assert bool(jnp.allclose(got, want, atol=1e-2, rtol=1e-2)), \
            float(jnp.max(jnp.abs(got - want)))

    print("KERNEL_OK")
</pallas_src>

<mosaic_0001>
module attributes {stable_mosaic.version = 11 : i64} {
  func.func @kernel(%arg0: i32, %arg1: memref<16x3xf32, #tpu.memory_space<vmem>>, %arg2: memref<3x128xf32, #tpu.memory_space<vmem>>, %arg3: memref<1x128xf32, #tpu.memory_space<vmem>>, %arg4: memref<32x128xf32, #tpu.memory_space<vmem>>, %arg5: memref<64x128xf32, #tpu.memory_space<vmem>>, %arg6: memref<1x128xf32, #tpu.memory_space<vmem>>, %arg7: memref<1x32xf32, #tpu.memory_space<vmem>>, %arg8: memref<1x32xf32, #tpu.memory_space<vmem>>, %arg9: memref<32x128xf32, #tpu.memory_space<vmem>>, %arg10: memref<1x128xf32, #tpu.memory_space<vmem>>, %arg11: memref<16x128xf32, #tpu.memory_space<vmem>>, %arg12: memref<16x32xf32, #tpu.memory_space<vmem>>) attributes {dimension_semantics = [#tpu.dimension_semantics<arbitrary>], iteration_bounds = array<i64: 1>, scalar_prefetch = 0 : i64, scratch_operands = 1 : i64, tpu.core_type = #tpu.core_type<tc>, window_params = [{pipeline_mode = #tpu.pipeline_mode<synchronous>, transform_indices = @transform_0, window_bounds = array<i64: 16, 3>}, {pipeline_mode = #tpu.pipeline_mode<synchronous>, transform_indices = @transform_1, window_bounds = array<i64: 3, 128>}, {pipeline_mode = #tpu.pipeline_mode<synchronous>, transform_indices = @transform_2, window_bounds = array<i64: 1, 128>}, {pipeline_mode = #tpu.pipeline_mode<synchronous>, transform_indices = @transform_3, window_bounds = array<i64: 32, 128>}, {pipeline_mode = #tpu.pipeline_mode<synchronous>, transform_indices = @transform_4, window_bounds = array<i64: 64, 128>}, {pipeline_mode = #tpu.pipeline_mode<synchronous>, transform_indices = @transform_5, window_bounds = array<i64: 1, 128>}, {pipeline_mode = #tpu.pipeline_mode<synchronous>, transform_indices = @transform_6, window_bounds = array<i64: 1, 32>}, {pipeline_mode = #tpu.pipeline_mode<synchronous>, transform_indices = @transform_7, window_bounds = array<i64: 1, 32>}, {pipeline_mode = #tpu.pipeline_mode<synchronous>, transform_indices = @transform_8, window_bounds = array<i64: 32, 128>}, {pipeline_mode = #tpu.pipeline_mode<synchronous>, transform_indices = @transform_9, window_bounds = array<i64: 1, 128>}, {pipeline_mode = #tpu.pipeline_mode<synchronous>, transform_indices = @transform_10, window_bounds = array<i64: 16, 128>}]} {
    %c0 = arith.constant 0 : index
    %c0_0 = arith.constant 0 : index
    %0 = vector.load %arg1[%c0, %c0_0] : memref<16x3xf32, #tpu.memory_space<vmem>>, vector<16x3xf32>
    %c0_1 = arith.constant 0 : index
    %c0_2 = arith.constant 0 : index
    %1 = vector.load %arg2[%c0_1, %c0_2] : memref<3x128xf32, #tpu.memory_space<vmem>>, vector<3x128xf32>
    %cst = arith.constant dense<0.000000e+00> : vector<16x128xf32>
    %2 = tpu.matmul %0, %1, %cst {dimension_numbers = #tpu.dot_dimension_numbers<[1], [0], [0], [1], [0, 0, 1, 1], [], []>} : vector<16x3xf32>, vector<3x128xf32>, vector<16x128xf32> -> vector<16x128xf32>
    %c0_3 = arith.constant 0 : index
    %c0_4 = arith.constant 0 : index
    %3 = vector.load %arg3[%c0_3, %c0_4] : memref<1x128xf32, #tpu.memory_space<vmem>>, vector<1x128xf32>
    %4 = vector.broadcast %3 : vector<1x128xf32> to vector<16x128xf32>
    %5 = arith.addf %2, %4 : vector<16x128xf32>
    %c0_5 = arith.constant 0 : index
    %c0_6 = arith.constant 0 : index
    %6 = vector.load %arg4[%c0_5, %c0_6] : memref<32x128xf32, #tpu.memory_space<vmem>>, vector<32x128xf32>
    %c0_7 = arith.constant 0 : index
    %c0_8 = arith.constant 0 : index
    %7 = vector.load %arg5[%c0_7, %c0_8] : memref<64x128xf32, #tpu.memory_space<vmem>>, vector<64x128xf32>
    %c0_9 = arith.constant 0 : index
    %c0_10 = arith.constant 0 : index
    %8 = vector.load %arg6[%c0_9, %c0_10] : memref<1x128xf32, #tpu.memory_space<vmem>>, vector<1x128xf32>
    %cst_11 = arith.constant 0.000000e+00 : f32
    %9 = vector.broadcast %cst_11 : f32 to vector<2x32xf32>
    %10 = vector.extract_strided_slice %5 {offsets = [0, 0], sizes = [2, 128], strides = [1, 1]} : vector<16x128xf32> to vector<2x128xf32>
    %cst_12 = arith.constant dense<0.000000e+00> : vector<2x128xf32>
    %11 = tpu.matmul %9, %6, %cst_12 {dimension_numbers = #tpu.dot_dimension_numbers<[1], [0], [0], [1], [0, 0, 1, 1], [], []>} : vector<2x32xf32>, vector<32x128xf32>, vector<2x128xf32> -> vector<2x128xf32>
    %12 = arith.addf %10, %11 : vector<2x128xf32>
    %13 = arith.negf %12 : vector<2x128xf32>
    %14 = math.exp %13 : vector<2x128xf32>
    %cst_13 = arith.constant 1.000000e+00 : f32
    %15 = vector.broadcast %cst_13 : f32 to vector<2x128xf32>
    %16 = arith.addf %15, %14 : vector<2x128xf32>
    %17 = arith.divf %15, %16 : vector<2x128xf32>
    %18 = math.tanh %12 : vector<2x128xf32>
    %19 = vector.extract_strided_slice %17 {offsets = [0, 0], sizes = [2, 32], strides = [1, 1]} : vector<2x128xf32> to vector<2x32xf32>
    %20 = vector.extract_strided_slice %17 {offsets = [0, 32], sizes = [2, 32], strides = [1, 1]} : vector<2x128xf32> to vector<2x32xf32>
    %21 = vector.extract_strided_slice %17 {offsets = [0, 96], sizes = [2, 32], strides = [1, 1]} : vector<2x128xf32> to vector<2x32xf32>
    %22 = vector.extract_strided_slice %18 {offsets = [0, 64], sizes = [2, 32], strides = [1, 1]} : vector<2x128xf32> to vector<2x32xf32>
    %23 = arith.mulf %20, %9 : vector<2x32xf32>
    %24 = arith.mulf %19, %22 : vector<2x32xf32>
    %25 = arith.addf %23, %24 : vector<2x32xf32>
    %26 = math.tanh %25 : vector<2x32xf32>
    %27 = arith.mulf %21, %26 : vector<2x32xf32>
    %28 = tpu.concatenate %27, %9 in 1 : vector<2x32xf32>, vector<2x32xf32> -> vector<2x64xf32>
    %cst_14 = arith.constant dense<0.000000e+00> : vector<2x128xf32>
    %29 = tpu.matmul %28, %7, %cst_14 {dimension_numbers = #tpu.dot_dimension_numbers<[1], [0], [0], [1], [0, 0, 1, 1], [], []>} : vector<2x64xf32>, vector<64x128xf32>, vector<2x128xf32> -> vector<2x128xf32>
    %30 = vector.broadcast %8 : vector<1x128xf32> to vector<2x128xf32>
    %31 = arith.addf %29, %30 : vector<2x128xf32>
    %32 = arith.negf %31 : vector<2x128xf32>
    %33 = math.exp %32 : vector<2x128xf32>
    %cst_15 = arith.constant 1.000000e+00 : f32
    %34 = vector.broadcast %cst_15 : f32 to vector<2x128xf32>
    %35 = arith.addf %34, %33 : vector<2x128xf32>
    %36 = arith.divf %34, %35 : vector<2x128xf32>
    %37 = math.tanh %31 : vector<2x128xf32>
    %38 = vector.extract_strided_slice %36 {offsets = [0, 0], sizes = [2, 32], strides = [1, 1]} : vector<2x128xf32> to vector<2x32xf32>
    %39 = vector.extract_strided_slice %36 {offsets = [0, 32], sizes = [2, 32], strides = [1, 1]} : vector<2x128xf32> to vector<2x32xf32>
    %40 = vector.extract_strided_slice %36 {offsets = [0, 96], sizes = [2, 32], strides = [1, 1]} : vector<2x128xf32> to vector<2x32xf32>
    %41 = vector.extract_strided_slice %37 {offsets = [0, 64], sizes = [2, 32], strides = [1, 1]} : vector<2x128xf32> to vector<2x32xf32>
    %42 = arith.mulf %39, %9 : vector<2x32xf32>
    %43 = arith.mulf %38, %41 : vector<2x32xf32>
    %44 = arith.addf %42, %43 : vector<2x32xf32>
    %45 = math.tanh %44 : vector<2x32xf32>
    %46 = arith.mulf %40, %45 : vector<2x32xf32>
    %c0_16 = arith.constant 0 : index
    %c0_17 = arith.constant 0 : index
    %47 = vector.load %arg12[%c0_16, %c0_17] : memref<16x32xf32, #tpu.memory_space<vmem>>, vector<2x32xf32>
    tpu.vector_store %arg12[%c0_16, %c0_17], %46 {strides = array<i32>} : memref<16x32xf32, #tpu.memory_space<vmem>>, vector<2x32xf32>,
    %48 = vector.extract_strided_slice %5 {offsets = [2, 0], sizes = [2, 128], strides = [1, 1]} : vector<16x128xf32> to vector<2x128xf32>
    %cst_18 = arith.constant dense<0.000000e+00> : vector<2x128xf32>
    %49 = tpu.matmul %27, %6, %cst_18 {dimension_numbers = #tpu.dot_dimension_numbers<[1], [0], [0], [1], [0, 0, 1, 1], [], []>} : vector<2x32xf32>, vector<32x128xf32>, vector<2x128xf32> -> vector<2x128xf32>
    %50 = arith.addf %48, %49 : vector<2x128xf32>
    %51 = arith.negf %50 : vector<2x128xf32>
    %52 = math.exp %51 : vector<2x128xf32>
    %cst_19 = arith.constant 1.000000e+00 : f32
    %53 = vector.broadcast %cst_19 : f32 to vector<2x128xf32>
    %54 = arith.addf %53, %52 : vector<2x128xf32>
    %55 = arith.divf %53, %54 : vector<2x128xf32>
    %56 = math.tanh %50 : vector<2x128xf32>
    %57 = vector.extract_strided_slice %55 {offsets = [0, 0], sizes = [2, 32], strides = [1, 1]} : vector<2x128xf32> to vector<2x32xf32>
    %58 = vector.extract_strided_slice %55 {offsets = [0, 32], sizes = [2, 32], strides = [1, 1]} : vector<2x128xf32> to vector<2x32xf32>
    %59 = vector.extract_strided_slice %55 {offsets = [0, 96], sizes = [2, 32], strides = [1, 1]} : vector<2x128xf32> to vector<2x32xf32>
    %60 = vector.extract_strided_slice %56 {offsets = [0, 64], sizes = [2, 32], strides = [1, 1]} : vector<2x128xf32> to vector<2x32xf32>
    %61 = arith.mulf %58, %25 : vector<2x32xf32>
    %62 = arith.mulf %57, %60 : vector<2x32xf32>
    %63 = arith.addf %61, %62 : vector<2x32xf32>
    %64 = math.tanh %63 : vector<2x32xf32>
    %65 = arith.mulf %59, %64 : vector<2x32xf32>
    %66 = tpu.concatenate %65, %46 in 1 : vector<2x32xf32>, vector<2x32xf32> -> vector<2x64xf32>
    %cst_20 = arith.constant dense<0.000000e+00> : vector<2x128xf32>
    %67 = tpu.matmul %66, %7, %cst_20 {dimension_numbers = #tpu.dot_dimension_numbers<[1], [0], [0], [1], [0, 0, 1, 1], [], []>} : vector<2x64xf32>, vector<64x128xf32>, vector<2x128xf32> -> vector<2x128xf32>
    %68 = vector.broadcast %8 : vector<1x128xf32> to vector<2x128xf32>
    %69 = arith.addf %67, %68 : vector<2x128xf32>
    %70 = arith.negf %69 : vector<2x128xf32>
    %71 = math.exp %70 : vector<2x128xf32>
    %cst_21 = arith.constant 1.000000e+00 : f32
    %72 = vector.broadcast %cst_21 : f32 to vector<2x128xf32>
    %73 = arith.addf %72, %71 : vector<2x128xf32>
    %74 = arith.divf %72, %73 : vector<2x128xf32>
    %75 = math.tanh %69 : vector<2x128xf32>
    %76 = vector.extract_strided_slice %74 {offsets = [0, 0], sizes = [2, 32], strides = [1, 1]} : vector<2x128xf32> to vector<2x32xf32>
    %77 = vector.extract_strided_slice %74 {offsets = [0, 32], sizes = [2, 32], strides = [1, 1]} : vector<2x128xf32> to vector<2x32xf32>
    %78 = vector.extract_strided_slice %74 {offsets = [0, 96], sizes = [2, 32], strides = [1, 1]} : vector<2x128xf32> to vector<2x32xf32>
    %79 = vector.extract_strided_slice %75 {offsets = [0, 64], sizes = [2, 32], strides = [1, 1]} : vector<2x128xf32> to vector<2x32xf32>
    %80 = arith.mulf %77, %44 : vector<2x32xf32>
    %81 = arith.mulf %76, %79 : vector<2x32xf32>
    %82 = arith.addf %80, %81 : vector<2x32xf32>
    %83 = math.tanh %82 : vector<2x32xf32>
    %84 = arith.mulf %78, %83 : vector<2x32xf32>
    %c2 = arith.constant 2 : index
    %c0_22 = arith.constant 0 : index
    %85 = vector.load %arg12[%c2, %c0_22] : memref<16x32xf32, #tpu.memory_space<vmem>>, vector<2x32xf32>
    tpu.vector_store %arg12[%c2, %c0_22], %84 {strides = array<i32>} : memref<16x32xf32, #tpu.memory_space<vmem>>, vector<2x32xf32>,
    %86 = vector.extract_strided_slice %5 {offsets = [4, 0], sizes = [2, 128], strides = [1, 1]} : vector<16x128xf32> to vector<2x128xf32>
    %cst_23 = arith.constant dense<0.000000e+00> : vector<2x128xf32>
    %87 = tpu.matmul %65, %6, %cst_23 {dimension_numbers = #tpu.dot_dimension_numbers<[1], [0], [0], [1], [0, 0, 1, 1], [], []>} : vector<2x32xf32>, vector<32x128xf32>, vector<2x128xf32> -> vector<2x128xf32>
    %88 = arith.addf %86, %87 : vector<2x128xf32>
    %89 = arith.negf %88 : vector<2x128xf32>
    %90 = math.exp %89 : vector<2x128xf32>
    %cst_24 = arith.constant 1.000000e+00 : f32
    %91 = vector.broadcast %cst_24 : f32 to vector<2x128xf32>
    %92 = arith.addf %91, %90 : vector<2x128xf32>
    %93 = arith.divf %91, %92 : vector<2x128xf32>
    %94 = math.tanh %88 : vector<2x128xf32>
    %95 = vector.extract_strided_slice %93 {offsets = [0, 0], sizes = [2, 32], strides = [1, 1]} : vector<2x128xf32> to vector<2x32xf32>
    %96 = vector.extract_strided_slice %93 {offsets = [0, 32], sizes = [2, 32], strides = [1, 1]} : vector<2x128xf32> to vector<2x32xf32>
    %97 = vector.extract_strided_slice %93 {offsets = [0, 96], sizes = [2, 32], strides = [1, 1]} : vector<2x128xf32> to vector<2x32xf32>
    %98 = vector.extract_strided_slice %94 {offsets = [0, 64], sizes = [2, 32], strides = [1, 1]} : vector<2x128xf32> to vector<2x32xf32>
    %99 = arith.mulf %96, %63 : vector<2x32xf32>
    %100 = arith.mulf %95, %98 : vector<2x32xf32>
    %101 = arith.addf %99, %100 : vector<2x32xf32>
    %102 = math.tanh %101 : vector<2x32xf32>
    %103 = arith.mulf %97, %102 : vector<2x32xf32>
    %104 = tpu.concatenate %103, %84 in 1 : vector<2x32xf32>, vector<2x32xf32> -> vector<2x64xf32>
    %cst_25 = arith.constant dense<0.000000e+00> : vector<2x128xf32>
    %105 = tpu.matmul %104, %7, %cst_25 {dimension_numbers = #tpu.dot_dimension_numbers<[1], [0], [0], [1], [0, 0, 1, 1], [], []>} : vector<2x64xf32>, vector<64x128xf32>, vector<2x128xf32> -> vector<2x128xf32>
    %106 = vector.broadcast %8 : vector<1x128xf32> to vector<2x128xf32>
    %107 = arith.addf %105, %106 : vector<2x128xf32>
    %108 = arith.negf %107 : vector<2x128xf32>
    %109 = math.exp %108 : vector<2x128xf32>
    %cst_26 = arith.constant 1.000000e+00 : f32
    %110 = vector.broadcast %cst_26 : f32 to vector<2x128xf32>
    %111 = arith.addf %110, %109 : vector<2x128xf32>
    %112 = arith.divf %110, %111 : vector<2x128xf32>
    %113 = math.tanh %107 : vector<2x128xf32>
    %114 = vector.extract_strided_slice %112 {offsets = [0, 0], sizes = [2, 32], strides = [1, 1]} : vector<2x128xf32> to vector<2x32xf32>
    %115 = vector.extract_strided_slice %112 {offsets = [0, 32], sizes = [2, 32], strides = [1, 1]} : vector<2x128xf32> to vector<2x32xf32>
    %116 = vector.extract_strided_slice %112 {offsets = [0, 96], sizes = [2, 32], strides = [1, 1]} : vector<2x128xf32> to vector<2x32xf32>
    %117 = vector.extract_strided_slice %113 {offsets = [0, 64], sizes = [2, 32], strides = [1, 1]} : vector<2x128xf32> to vector<2x32xf32>
    %118 = arith.mulf %115, %82 : vector<2x32xf32>
    %119 = arith.mulf %114, %117 : vector<2x32xf32>
    %120 = arith.addf %118, %119 : vector<2x32xf32>
    %121 = math.tanh %120 : vector<2x32xf32>
    %122 = arith.mulf %116, %121 : vector<2x32xf32>
    %c4 = arith.constant 4 : index
    %c0_27 = arith.constant 0 : index
    %123 = vector.load %arg12[%c4, %c0_27] : memref<16x32xf32, #tpu.memory_space<vmem>>, vector<2x32xf32>
    tpu.vector_store %arg12[%c4, %c0_27], %122 {strides = array<i32>} : memref<16x32xf32, #tpu.memory_space<vmem>>, vector<2x32xf32>,
    %124 = vector.extract_strided_slice %5 {offsets = [6, 0], sizes = [2, 128], strides = [1, 1]} : vector<16x128xf32> to vector<2x128xf32>
    %cst_28 = arith.constant dense<0.000000e+00> : vector<2x128xf32>
    %125 = tpu.matmul %103, %6, %cst_28 {dimension_numbers = #tpu.dot_dimension_numbers<[1], [0], [0], [1], [0, 0, 1, 1], [], []>} : vector<2x32xf32>, vector<32x128xf32>, vector<2x128xf32> -> vector<2x128xf32>
    %126 = arith.addf %124, %125 : vector<2x128xf32>
    %127 = arith.negf %126 : vector<2x128xf32>
    %128 = math.exp %127 : vector<2x128xf32>
    %cst_29 = arith.constant 1.000000e+00 : f32
    %129 = vector.broadcast %cst_29 : f32 to vector<2x128xf32>
    %130 = arith.addf %129, %128 : vector<2x128xf32>
    %131 = arith.divf %129, %130 : vector<2x128xf32>
    %132 = math.tanh %126 : vector<2x128xf32>
    %133 = vector.extract_strided_slice %131 {offsets = [0, 0], sizes = [2, 32], strides = [1, 1]} : vector<2x128xf32> to vector<2x32xf32>
    %134 = vector.extract_strided_slice %131 {offsets = [0, 32], sizes = [2, 32], strides = [1, 1]} : vector<2x128xf32> to vector<2x32xf32>
    %135 = vector.extract_strided_slice %131 {offsets = [0, 96], sizes = [2, 32], strides = [1, 1]} : vector<2x128xf32> to vector<2x32xf32>
    %136 = vector.extract_strided_slice %132 {offsets = [0, 64], sizes = [2, 32], strides = [1, 1]} : vector<2x128xf32> to vector<2x32xf32>
    %137 = arith.mulf %134, %101 : vector<2x32xf32>
    %138 = arith.mulf %133, %136 : vector<2x32xf32>
    %139 = arith.addf %137, %138 : vector<2x32xf32>
    %140 = math.tanh %139 : vector<2x32xf32>
    %141 = arith.mulf %135, %140 : vector<2x32xf32>
    %142 = tpu.concatenate %141, %122 in 1 : vector<2x32xf32>, vector<2x32xf32> -> vector<2x64xf32>
    %cst_30 = arith.constant dense<0.000000e+00> : vector<2x128xf32>
    %143 = tpu.matmul %142, %7, %cst_30 {dimension_numbers = #tpu.dot_dimension_numbers<[1], [0], [0], [1], [0, 0, 1, 1], [], []>} : vector<2x64xf32>, vector<64x128xf32>, vector<2x128xf32> -> vector<2x128xf32>
    %144 = vector.broadcast %8 : vector<1x128xf32> to vector<2x128xf32>
    %145 = arith.addf %143, %144 : vector<2x128xf32>
    %146 = arith.negf %145 : vector<2x128xf32>
    %147 = math.exp %146 : vector<2x128xf32>
    %cst_31 = arith.constant 1.000000e+00 : f32
    %148 = vector.broadcast %cst_31 : f32 to vector<2x128xf32>
    %149 = arith.addf %148, %147 : vector<2x128xf32>
    %150 = arith.divf %148, %149 : vector<2x128xf32>
    %151 = math.tanh %145 : vector<2x128xf32>
    %152 = vector.extract_strided_slice %150 {offsets = [0, 0], sizes = [2, 32], strides = [1, 1]} : vector<2x128xf32> to vector<2x32xf32>
    %153 = vector.extract_strided_slice %150 {offsets = [0, 32], sizes = [2, 32], strides = [1, 1]} : vector<2x128xf32> to vector<2x32xf32>
    %154 = vector.extract_strided_slice %150 {offsets = [0, 96], sizes = [2, 32], strides = [1, 1]} : vector<2x128xf32> to vector<2x32xf32>
    %155 = vector.extract_strided_slice %151 {offsets = [0, 64], sizes = [2, 32], strides = [1, 1]} : vector<2x128xf32> to vector<2x32xf32>
    %156 = arith.mulf %153, %120 : vector<2x32xf32>
    %157 = arith.mulf %152, %155 : vector<2x32xf32>
    %158 = arith.addf %156, %157 : vector<2x32xf32>
    %159 = math.tanh %158 : vector<2x32xf32>
    %160 = arith.mulf %154, %159 : vector<2x32xf32>
    %c6 = arith.constant 6 : index
    %c0_32 = arith.constant 0 : index
    %161 = vector.load %arg12[%c6, %c0_32] : memref<16x32xf32, #tpu.memory_space<vmem>>, vector<2x32xf32>
    tpu.vector_store %arg12[%c6, %c0_32], %160 {strides = array<i32>} : memref<16x32xf32, #tpu.memory_space<vmem>>, vector<2x32xf32>,
    %162 = vector.extract_strided_slice %5 {offsets = [8, 0], sizes = [2, 128], strides = [1, 1]} : vector<16x128xf32> to vector<2x128xf32>
    %cst_33 = arith.constant dense<0.000000e+00> : vector<2x128xf32>
    %163 = tpu.matmul %141, %6, %cst_33 {dimension_numbers = #tpu.dot_dimension_numbers<[1], [0], [0], [1], [0, 0, 1, 1], [], []>} : vector<2x32xf32>, vector<32x128xf32>, vector<2x128xf32> -> vector<2x128xf32>
    %164 = arith.addf %162, %163 : vector<2x128xf32>
    %165 = arith.negf %164 : vector<2x128xf32>
    %166 = math.exp %165 : vector<2x128xf32>
    %cst_34 = arith.constant 1.000000e+00 : f32
    %167 = vector.broadcast %cst_34 : f32 to vector<2x128xf32>
    %168 = arith.addf %167, %166 : vector<2x128xf32>
    %169 = arith.divf %167, %168 : vector<2x128xf32>
    %170 = math.tanh %164 : vector<2x128xf32>
    %171 = vector.extract_strided_slice %169 {offsets = [0, 0], sizes = [2, 32], strides = [1, 1]} : vector<2x128xf32> to vector<2x32xf32>
    %172 = vector.extract_strided_slice %169 {offsets = [0, 32], sizes = [2, 32], strides = [1, 1]} : vector<2x128xf32> to vector<2x32xf32>
    %173 = vector.extract_strided_slice %169 {offsets = [0, 96], sizes = [2, 32], strides = [1, 1]} : vector<2x128xf32> to vector<2x32xf32>
    %174 = vector.extract_strided_slice %170 {offsets = [0, 64], sizes = [2, 32], strides = [1, 1]} : vector<2x128xf32> to vector<2x32xf32>
    %175 = arith.mulf %172, %139 : vector<2x32xf32>
    %176 = arith.mulf %171, %174 : vector<2x32xf32>
    %177 = arith.addf %175, %176 : vector<2x32xf32>
    %178 = math.tanh %177 : vector<2x32xf32>
    %179 = arith.mulf %173, %178 : vector<2x32xf32>
    %180 = tpu.concatenate %179, %160 in 1 : vector<2x32xf32>, vector<2x32xf32> -> vector<2x64xf32>
    %cst_35 = arith.constant dense<0.000000e+00> : vector<2x128xf32>
    %181 = tpu.matmul %180, %7, %cst_35 {dimension_numbers = #tpu.dot_dimension_numbers<[1], [0], [0], [1], [0, 0, 1, 1], [], []>} : vector<2x64xf32>, vector<64x128xf32>, vector<2x128xf32> -> vector<2x128xf32>
    %182 = vector.broadcast %8 : vector<1x128xf32> to vector<2x128xf32>
    %183 = arith.addf %181, %182 : vector<2x128xf32>
    %184 = arith.negf %183 : vector<2x128xf32>
    %185 = math.exp %184 : vector<2x128xf32>
    %cst_36 = arith.constant 1.000000e+00 : f32
    %186 = vector.broadcast %cst_36 : f32 to vector<2x128xf32>
    %187 = arith.addf %186, %185 : vector<2x128xf32>
    %188 = arith.divf %186, %187 : vector<2x128xf32>
    %189 = math.tanh %183 : vector<2x128xf32>
    %190 = vector.extract_strided_slice %188 {offsets = [0, 0], sizes = [2, 32], strides = [1, 1]} : vector<2x128xf32> to vector<2x32xf32>
    %191 = vector.extract_strided_slice %188 {offsets = [0, 32], sizes = [2, 32], strides = [1, 1]} : vector<2x128xf32> to vector<2x32xf32>
    %192 = vector.extract_strided_slice %188 {offsets = [0, 96], sizes = [2, 32], strides = [1, 1]} : vector<2x128xf32> to vector<2x32xf32>
    %193 = vector.extract_strided_slice %189 {offsets = [0, 64], sizes = [2, 32], strides = [1, 1]} : vector<2x128xf32> to vector<2x32xf32>
    %194 = arith.mulf %191, %158 : vector<2x32xf32>
    %195 = arith.mulf %190, %193 : vector<2x32xf32>
    %196 = arith.addf %194, %195 : vector<2x32xf32>
    %197 = math.tanh %196 : vector<2x32xf32>
    %198 = arith.mulf %192, %197 : vector<2x32xf32>
    %c8 = arith.constant 8 : index
    %c0_37 = arith.constant 0 : index
    %199 = vector.load %arg12[%c8, %c0_37] : memref<16x32xf32, #tpu.memory_space<vmem>>, vector<2x32xf32>
    tpu.vector_store %arg12[%c8, %c0_37], %198 {strides = array<i32>} : memref<16x32xf32, #tpu.memory_space<vmem>>, vector<2x32xf32>,
    %200 = vector.extract_strided_slice %5 {offsets = [10, 0], sizes = [2, 128], strides = [1, 1]} : vector<16x128xf32> to vector<2x128xf32>
    %cst_38 = arith.constant dense<0.000000e+00> : vector<2x128xf32>
    %201 = tpu.matmul %179, %6, %cst_38 {dimension_numbers = #tpu.dot_dimension_numbers<[1], [0], [0], [1], [0, 0, 1, 1], [], []>} : vector<2x32xf32>, vector<32x128xf32>, vector<2x128xf32> -> vector<2x128xf32>
    %202 = arith.addf %200, %201 : vector<2x128xf32>
    %203 = arith.negf %202 : vector<2x128xf32>
    %204 = math.exp %203 : vector<2x128xf32>
    %cst_39 = arith.constant 1.000000e+00 : f32
    %205 = vector.broadcast %cst_39 : f32 to vector<2x128xf32>
    %206 = arith.addf %205, %204 : vector<2x128xf32>
    %207 = arith.divf %205, %206 : vector<2x128xf32>
    %208 = math.tanh %202 : vector<2x128xf32>
    %209 = vector.extract_strided_slice %207 {offsets = [0, 0], sizes = [2, 32], strides = [1, 1]} : vector<2x128xf32> to vector<2x32xf32>
    %210 = vector.extract_strided_slice %207 {offsets = [0, 32], sizes = [2, 32], strides = [1, 1]} : vector<2x128xf32> to vector<2x32xf32>
    %211 = vector.extract_strided_slice %207 {offsets = [0, 96], sizes = [2, 32], strides = [1, 1]} : vector<2x128xf32> to vector<2x32xf32>
    %212 = vector.extract_strided_slice %208 {offsets = [0, 64], sizes = [2, 32], strides = [1, 1]} : vector<2x128xf32> to vector<2x32xf32>
    %213 = arith.mulf %210, %177 : vector<2x32xf32>
    %214 = arith.mulf %209, %212 : vector<2x32xf32>
    %215 = arith.addf %213, %214 : vector<2x32xf32>
    %216 = math.tanh %215 : vector<2x32xf32>
    %217 = arith.mulf %211, %216 : vector<2x32xf32>
    %218 = tpu.concatenate %217, %198 in 1 : vector<2x32xf32>, vector<2x32xf32> -> vector<2x64xf32>
    %cst_40 = arith.constant dense<0.000000e+00> : vector<2x128xf32>
    %219 = tpu.matmul %218, %7, %cst_40 {dimension_numbers = #tpu.dot_dimension_numbers<[1], [0], [0], [1], [0, 0, 1, 1], [], []>} : vector<2x64xf32>, vector<64x128xf32>, vector<2x128xf32> -> vector<2x128xf32>
    %220 = vector.broadcast %8 : vector<1x128xf32> to vector<2x128xf32>
    %221 = arith.addf %219, %220 : vector<2x128xf32>
    %222 = arith.negf %221 : vector<2x128xf32>
    %223 = math.exp %222 : vector<2x128xf32>
    %cst_41 = arith.constant 1.000000e+00 : f32
    %224 = vector.broadcast %cst_41 : f32 to vector<2x128xf32>
    %225 = arith.addf %224, %223 : vector<2x128xf32>
    %226 = arith.divf %224, %225 : vector<2x128xf32>
    %227 = math.tanh %221 : vector<2x128xf32>
    %228 = vector.extract_strided_slice %226 {offsets = [0, 0], sizes = [2, 32], strides = [1, 1]} : vector<2x128xf32> to vector<2x32xf32>
    %229 = vector.extract_strided_slice %226 {offsets = [0, 32], sizes = [2, 32], strides = [1, 1]} : vector<2x128xf32> to vector<2x32xf32>
    %230 = vector.extract_strided_slice %226 {offsets = [0, 96], sizes = [2, 32], strides = [1, 1]} : vector<2x128xf32> to vector<2x32xf32>
    %231 = vector.extract_strided_slice %227 {offsets = [0, 64], sizes = [2, 32], strides = [1, 1]} : vector<2x128xf32> to vector<2x32xf32>
    %232 = arith.mulf %229, %196 : vector<2x32xf32>
    %233 = arith.mulf %228, %231 : vector<2x32xf32>
    %234 = arith.addf %232, %233 : vector<2x32xf32>
    %235 = math.tanh %234 : vector<2x32xf32>
    %236 = arith.mulf %230, %235 : vector<2x32xf32>
    %c10 = arith.constant 10 : index
    %c0_42 = arith.constant 0 : index
    %237 = vector.load %arg12[%c10, %c0_42] : memref<16x32xf32, #tpu.memory_space<vmem>>, vector<2x32xf32>
    tpu.vector_store %arg12[%c10, %c0_42], %236 {strides = array<i32>} : memref<16x32xf32, #tpu.memory_space<vmem>>, vector<2x32xf32>,
    %238 = vector.extract_strided_slice %5 {offsets = [12, 0], sizes = [2, 128], strides = [1, 1]} : vector<16x128xf32> to vector<2x128xf32>
    %cst_43 = arith.constant dense<0.000000e+00> : vector<2x128xf32>
    %239 = tpu.matmul %217, %6, %cst_43 {dimension_numbers = #tpu.dot_dimension_numbers<[1], [0], [0], [1], [0, 0, 1, 1], [], []>} : vector<2x32xf32>, vector<32x128xf32>, vector<2x128xf32> -> vector<2x128xf32>
    %240 = arith.addf %238, %239 : vector<2x128xf32>
    %241 = arith.negf %240 : vector<2x128xf32>
    %242 = math.exp %241 : vector<2x128xf32>
    %cst_44 = arith.constant 1.000000e+00 : f32
    %243 = vector.broadcast %cst_44 : f32 to vector<2x128xf32>
    %244 = arith.addf %243, %242 : vector<2x128xf32>
    %245 = arith.divf %243, %244 : vector<2x128xf32>
    %246 = math.tanh %240 : vector<2x128xf32>
    %247 = vector.extract_strided_slice %245 {offsets = [0, 0], sizes = [2, 32], strides = [1, 1]} : vector<2x128xf32> to vector<2x32xf32>
    %248 = vector.extract_strided_slice %245 {offsets = [0, 32], sizes = [2, 32], strides = [1, 1]} : vector<2x128xf32> to vector<2x32xf32>
    %249 = vector.extract_strided_slice %245 {offsets = [0, 96], sizes = [2, 32], strides = [1, 1]} : vector<2x128xf32> to vector<2x32xf32>
    %250 = vector.extract_strided_slice %246 {offsets = [0, 64], sizes = [2, 32], strides = [1, 1]} : vector<2x128xf32> to vector<2x32xf32>
    %251 = arith.mulf %248, %215 : vector<2x32xf32>
    %252 = arith.mulf %247, %250 : vector<2x32xf32>
    %253 = arith.addf %251, %252 : vector<2x32xf32>
    %254 = math.tanh %253 : vector<2x32xf32>
    %255 = arith.mulf %249, %254 : vector<2x32xf32>
    %256 = tpu.concatenate %255, %236 in 1 : vector<2x32xf32>, vector<2x32xf32> -> vector<2x64xf32>
    %cst_45 = arith.constant dense<0.000000e+00> : vector<2x128xf32>
    %257 = tpu.matmul %256, %7, %cst_45 {dimension_numbers = #tpu.dot_dimension_numbers<[1], [0], [0], [1], [0, 0, 1, 1], [], []>} : vector<2x64xf32>, vector<64x128xf32>, vector<2x128xf32> -> vector<2x128xf32>
    %258 = vector.broadcast %8 : vector<1x128xf32> to vector<2x128xf32>
    %259 = arith.addf %257, %258 : vector<2x128xf32>
    %260 = arith.negf %259 : vector<2x128xf32>
    %261 = math.exp %260 : vector<2x128xf32>
    %cst_46 = arith.constant 1.000000e+00 : f32
    %262 = vector.broadcast %cst_46 : f32 to vector<2x128xf32>
    %263 = arith.addf %262, %261 : vector<2x128xf32>
    %264 = arith.divf %262, %263 : vector<2x128xf32>
    %265 = math.tanh %259 : vector<2x128xf32>
    %266 = vector.extract_strided_slice %264 {offsets = [0, 0], sizes = [2, 32], strides = [1, 1]} : vector<2x128xf32> to vector<2x32xf32>
    %267 = vector.extract_strided_slice %264 {offsets = [0, 32], sizes = [2, 32], strides = [1, 1]} : vector<2x128xf32> to vector<2x32xf32>
    %268 = vector.extract_strided_slice %264 {offsets = [0, 96], sizes = [2, 32], strides = [1, 1]} : vector<2x128xf32> to vector<2x32xf32>
    %269 = vector.extract_strided_slice %265 {offsets = [0, 64], sizes = [2, 32], strides = [1, 1]} : vector<2x128xf32> to vector<2x32xf32>
    %270 = arith.mulf %267, %234 : vector<2x32xf32>
    %271 = arith.mulf %266, %269 : vector<2x32xf32>
    %272 = arith.addf %270, %271 : vector<2x32xf32>
    %273 = math.tanh %272 : vector<2x32xf32>
    %274 = arith.mulf %268, %273 : vector<2x32xf32>
    %c12 = arith.constant 12 : index
    %c0_47 = arith.constant 0 : index
    %275 = vector.load %arg12[%c12, %c0_47] : memref<16x32xf32, #tpu.memory_space<vmem>>, vector<2x32xf32>
    tpu.vector_store %arg12[%c12, %c0_47], %274 {strides = array<i32>} : memref<16x32xf32, #tpu.memory_space<vmem>>, vector<2x32xf32>,
    %276 = vector.extract_strided_slice %5 {offsets = [14, 0], sizes = [2, 128], strides = [1, 1]} : vector<16x128xf32> to vector<2x128xf32>
    %cst_48 = arith.constant dense<0.000000e+00> : vector<2x128xf32>
    %277 = tpu.matmul %255, %6, %cst_48 {dimension_numbers = #tpu.dot_dimension_numbers<[1], [0], [0], [1], [0, 0, 1, 1], [], []>} : vector<2x32xf32>, vector<32x128xf32>, vector<2x128xf32> -> vector<2x128xf32>
    %278 = arith.addf %276, %277 : vector<2x128xf32>
    %279 = arith.negf %278 : vector<2x128xf32>
    %280 = math.exp %279 : vector<2x128xf32>
    %cst_49 = arith.constant 1.000000e+00 : f32
    %281 = vector.broadcast %cst_49 : f32 to vector<2x128xf32>
    %282 = arith.addf %281, %280 : vector<2x128xf32>
    %283 = arith.divf %281, %282 : vector<2x128xf32>
    %284 = math.tanh %278 : vector<2x128xf32>
    %285 = vector.extract_strided_slice %283 {offsets = [0, 0], sizes = [2, 32], strides = [1, 1]} : vector<2x128xf32> to vector<2x32xf32>
    %286 = vector.extract_strided_slice %283 {offsets = [0, 32], sizes = [2, 32], strides = [1, 1]} : vector<2x128xf32> to vector<2x32xf32>
    %287 = vector.extract_strided_slice %283 {offsets = [0, 96], sizes = [2, 32], strides = [1, 1]} : vector<2x128xf32> to vector<2x32xf32>
    %288 = vector.extract_strided_slice %284 {offsets = [0, 64], sizes = [2, 32], strides = [1, 1]} : vector<2x128xf32> to vector<2x32xf32>
    %289 = arith.mulf %286, %253 : vector<2x32xf32>
    %290 = arith.mulf %285, %288 : vector<2x32xf32>
    %291 = arith.addf %289, %290 : vector<2x32xf32>
    %292 = math.tanh %291 : vector<2x32xf32>
    %293 = arith.mulf %287, %292 : vector<2x32xf32>
    %294 = tpu.concatenate %293, %274 in 1 : vector<2x32xf32>, vector<2x32xf32> -> vector<2x64xf32>
    %cst_50 = arith.constant dense<0.000000e+00> : vector<2x128xf32>
    %295 = tpu.matmul %294, %7, %cst_50 {dimension_numbers = #tpu.dot_dimension_numbers<[1], [0], [0], [1], [0, 0, 1, 1], [], []>} : vector<2x64xf32>, vector<64x128xf32>, vector<2x128xf32> -> vector<2x128xf32>
    %296 = vector.broadcast %8 : vector<1x128xf32> to vector<2x128xf32>
    %297 = arith.addf %295, %296 : vector<2x128xf32>
    %298 = arith.negf %297 : vector<2x128xf32>
    %299 = math.exp %298 : vector<2x128xf32>
    %cst_51 = arith.constant 1.000000e+00 : f32
    %300 = vector.broadcast %cst_51 : f32 to vector<2x128xf32>
    %301 = arith.addf %300, %299 : vector<2x128xf32>
    %302 = arith.divf %300, %301 : vector<2x128xf32>
    %303 = math.tanh %297 : vector<2x128xf32>
    %304 = vector.extract_strided_slice %302 {offsets = [0, 0], sizes = [2, 32], strides = [1, 1]} : vector<2x128xf32> to vector<2x32xf32>
    %305 = vector.extract_strided_slice %302 {offsets = [0, 32], sizes = [2, 32], strides = [1, 1]} : vector<2x128xf32> to vector<2x32xf32>
    %306 = vector.extract_strided_slice %302 {offsets = [0, 96], sizes = [2, 32], strides = [1, 1]} : vector<2x128xf32> to vector<2x32xf32>
    %307 = vector.extract_strided_slice %303 {offsets = [0, 64], sizes = [2, 32], strides = [1, 1]} : vector<2x128xf32> to vector<2x32xf32>
    %308 = arith.mulf %305, %272 : vector<2x32xf32>
    %309 = arith.mulf %304, %307 : vector<2x32xf32>
    %310 = arith.addf %308, %309 : vector<2x32xf32>
    %311 = math.tanh %310 : vector<2x32xf32>
    %312 = arith.mulf %306, %311 : vector<2x32xf32>
    %c14 = arith.constant 14 : index
    %c0_52 = arith.constant 0 : index
    %313 = vector.load %arg12[%c14, %c0_52] : memref<16x32xf32, #tpu.memory_space<vmem>>, vector<2x32xf32>
    tpu.vector_store %arg12[%c14, %c0_52], %312 {strides = array<i32>} : memref<16x32xf32, #tpu.memory_space<vmem>>, vector<2x32xf32>,
    %c0_53 = arith.constant 0 : index
    %c0_54 = arith.constant 0 : index
    %314 = vector.load %arg12[%c0_53, %c0_54] : memref<16x32xf32, #tpu.memory_space<vmem>>, vector<16x32xf32>
    %cst_55 = arith.constant dense<0.000000e+00> : vector<16xf32>
    %315 = vector.multi_reduction <add>, %314, %cst_55 [1] : vector<16x32xf32> to vector<16xf32>
    %316 = vector.shape_cast %315 : vector<16xf32> to vector<16x1xf32>
    %cst_56 = arith.constant 3.200000e+01 : f32
    %317 = vector.broadcast %cst_56 : f32 to vector<16x1xf32>
    %318 = arith.divf %316, %317 : vector<16x1xf32>
    %319 = vector.broadcast %318 : vector<16x1xf32> to vector<16x32xf32>
    %320 = arith.subf %314, %319 : vector<16x32xf32>
    %321 = arith.mulf %320, %320 : vector<16x32xf32>
    %cst_57 = arith.constant dense<0.000000e+00> : vector<16xf32>
    %322 = vector.multi_reduction <add>, %321, %cst_57 [1] : vector<16x32xf32> to vector<16xf32>
    %323 = vector.shape_cast %322 : vector<16xf32> to vector<16x1xf32>
    %cst_58 = arith.constant 3.200000e+01 : f32
    %324 = vector.broadcast %cst_58 : f32 to vector<16x1xf32>
    %325 = arith.divf %323, %324 : vector<16x1xf32>
    %326 = vector.broadcast %318 : vector<16x1xf32> to vector<16x32xf32>
    %327 = arith.subf %314, %326 : vector<16x32xf32>
    %cst_59 = arith.constant 9.99999974E-6 : f32
    %328 = vector.broadcast %cst_59 : f32 to vector<16x1xf32>
    %329 = arith.addf %325, %328 : vector<16x1xf32>
    %330 = math.rsqrt %329 : vector<16x1xf32>
    %331 = vector.broadcast %330 : vector<16x1xf32> to vector<16x32xf32>
    %332 = arith.mulf %327, %331 : vector<16x32xf32>
    %c0_60 = arith.constant 0 : index
    %c0_61 = arith.constant 0 : index
    %333 = vector.load %arg7[%c0_60, %c0_61] : memref<1x32xf32, #tpu.memory_space<vmem>>, vector<1x32xf32>
    %334 = vector.broadcast %333 : vector<1x32xf32> to vector<16x32xf32>
    %335 = arith.mulf %332, %334 : vector<16x32xf32>
    %c0_62 = arith.constant 0 : index
    %c0_63 = arith.constant 0 : index
    %336 = vector.load %arg8[%c0_62, %c0_63] : memref<1x32xf32, #tpu.memory_space<vmem>>, vector<1x32xf32>
    %337 = vector.broadcast %336 : vector<1x32xf32> to vector<16x32xf32>
    %338 = arith.addf %335, %337 : vector<16x32xf32>
    %c0_64 = arith.constant 0 : index
    %c0_65 = arith.constant 0 : index
    %339 = vector.load %arg9[%c0_64, %c0_65] : memref<32x128xf32, #tpu.memory_space<vmem>>, vector<32x128xf32>
    %cst_66 = arith.constant dense<0.000000e+00> : vector<16x128xf32>
    %340 = tpu.matmul %338, %339, %cst_66 {dimension_numbers = #tpu.dot_dimension_numbers<[1], [0], [0], [1], [0, 0, 1, 1], [], []>} : vector<16x32xf32>, vector<32x128xf32>, vector<16x128xf32> -> vector<16x128xf32>
    %c0_67 = arith.constant 0 : index
    %c0_68 = arith.constant 0 : index
    %341 = vector.load %arg10[%c0_67, %c0_68] : memref<1x128xf32, #tpu.memory_space<vmem>>, vector<1x128xf32>
    %342 = vector.broadcast %341 : vector<1x128xf32> to vector<16x128xf32>
    %343 = arith.addf %340, %342 : vector<16x128xf32>
    %344 = tpu.iota {dimensions = array<i32: 1>} : vector<16x128xi32>
    %c5_i32 = arith.constant 5 : i32
    %345 = vector.broadcast %c5_i32 : i32 to vector<16x128xi32>
    %346 = arith.cmpi slt, %344, %345 : vector<16x128xi32>
    %cst_69 = arith.constant -1.000000e+30 : f32
    %347 = vector.broadcast %cst_69 : f32 to vector<16x128xf32>
    %348 = arith.select %346, %343, %347 : vector<16x128xi1>, vector<16x128xf32>
    %cst_70 = arith.constant dense<0xFF800000> : vector<16xf32>
    %349 = vector.multi_reduction <maximumf>, %348, %cst_70 [1] : vector<16x128xf32> to vector<16xf32>
    %350 = vector.shape_cast %349 : vector<16xf32> to vector<16x1xf32>
    %351 = vector.broadcast %350 : vector<16x1xf32> to vector<16x128xf32>
    %352 = arith.subf %343, %351 : vector<16x128xf32>
    %353 = math.exp %352 : vector<16x128xf32>
    %cst_71 = arith.constant 0.000000e+00 : f32
    %354 = vector.broadcast %cst_71 : f32 to vector<16x128xf32>
    %355 = arith.select %346, %353, %354 : vector<16x128xi1>, vector<16x128xf32>
    %cst_72 = arith.constant dense<0.000000e+00> : vector<16xf32>
    %356 = vector.multi_reduction <add>, %355, %cst_72 [1] : vector<16x128xf32> to vector<16xf32>
    %357 = vector.shape_cast %356 : vector<16xf32> to vector<16x1xf32>
    %358 = vector.broadcast %357 : vector<16x1xf32> to vector<16x128xf32>
    %359 = arith.divf %355, %358 : vector<16x128xf32>
    %360 = math.exp %343 : vector<16x128xf32>
    %361 = math.tanh %343 : vector<16x128xf32>
    %362 = arith.negf %343 : vector<16x128xf32>
    %363 = math.exp %362 : vector<16x128xf32>
    %cst_73 = arith.constant 1.000000e+00 : f32
    %364 = vector.broadcast %cst_73 : f32 to vector<16x128xf32>
    %365 = arith.addf %364, %363 : vector<16x128xf32>
    %366 = arith.divf %364, %365 : vector<16x128xf32>
    %367 = arith.select %346, %359, %343 : vector<16x128xi1>, vector<16x128xf32>
    %c15_i32 = arith.constant 15 : i32
    %368 = vector.broadcast %c15_i32 : i32 to vector<16x128xi32>
    %369 = arith.cmpi sge, %344, %368 : vector<16x128xi32>
    %c25_i32 = arith.constant 25 : i32
    %370 = vector.broadcast %c25_i32 : i32 to vector<16x128xi32>
    %371 = arith.cmpi slt, %344, %370 : vector<16x128xi32>
    %372 = arith.andi %369, %371 : vector<16x128xi1>
    %373 = arith.select %372, %360, %367 : vector<16x128xi1>, vector<16x128xf32>
    %c25_i32_74 = arith.constant 25 : i32
    %374 = vector.broadcast %c25_i32_74 : i32 to vector<16x128xi32>
    %375 = arith.cmpi sge, %344, %374 : vector<16x128xi32>
    %c30_i32 = arith.constant 30 : i32
    %376 = vector.broadcast %c30_i32 : i32 to vector<16x128xi32>
    %377 = arith.cmpi slt, %344, %376 : vector<16x128xi32>
    %378 = arith.andi %375, %377 : vector<16x128xi1>
    %379 = arith.select %378, %361, %373 : vector<16x128xi1>, vector<16x128xf32>
    %c30_i32_75 = arith.constant 30 : i32
    %380 = vector.broadcast %c30_i32_75 : i32 to vector<16x128xi32>
    %381 = arith.cmpi sge, %344, %380 : vector<16x128xi32>
    %382 = arith.select %381, %366, %379 : vector<16x128xi1>, vector<16x128xf32>
    %c0_76 = arith.constant 0 : index
    %c0_77 = arith.constant 0 : index
    %383 = vector.load %arg11[%c0_76, %c0_77] : memref<16x128xf32, #tpu.memory_space<vmem>>, vector<16x128xf32>
    tpu.vector_store %arg11[%c0_76, %c0_77], %382 {strides = array<i32>} : memref<16x128xf32, #tpu.memory_space<vmem>>, vector<16x128xf32>,
    return
  }
  func.func @transform_0(%arg0: i32) -> (i32, i32) {
    %c0_i32 = arith.constant 0 : i32
    %c0_i32_0 = arith.constant 0 : i32
    %c0_i32_1 = arith.constant 0 : i32
    return %c0_i32, %c0_i32_0 : i32, i32
  }
  func.func @transform_1(%arg0: i32) -> (i32, i32) {
    %c0_i32 = arith.constant 0 : i32
    %c0_i32_0 = arith.constant 0 : i32
    %c0_i32_1 = arith.constant 0 : i32
    return %c0_i32, %c0_i32_0 : i32, i32
  }
  func.func @transform_2(%arg0: i32) -> (i32, i32) {
    %c0_i32 = arith.constant 0 : i32
    %c0_i32_0 = arith.constant 0 : i32
    %c0_i32_1 = arith.constant 0 : i32
    return %c0_i32, %c0_i32_0 : i32, i32
  }
  func.func @transform_3(%arg0: i32) -> (i32, i32) {
    %c0_i32 = arith.constant 0 : i32
    %c0_i32_0 = arith.constant 0 : i32
    %c0_i32_1 = arith.constant 0 : i32
    return %c0_i32, %c0_i32_0 : i32, i32
  }
  func.func @transform_4(%arg0: i32) -> (i32, i32) {
    %c0_i32 = arith.constant 0 : i32
    %c0_i32_0 = arith.constant 0 : i32
    %c0_i32_1 = arith.constant 0 : i32
    return %c0_i32, %c0_i32_0 : i32, i32
  }
  func.func @transform_5(%arg0: i32) -> (i32, i32) {
    %c0_i32 = arith.constant 0 : i32
    %c0_i32_0 = arith.constant 0 : i32
    %c0_i32_1 = arith.constant 0 : i32
    return %c0_i32, %c0_i32_0 : i32, i32
  }
  func.func @transform_6(%arg0: i32) -> (i32, i32) {
    %c0_i32 = arith.constant 0 : i32
    %c0_i32_0 = arith.constant 0 : i32
    %c0_i32_1 = arith.constant 0 : i32
    return %c0_i32, %c0_i32_0 : i32, i32
  }
  func.func @transform_7(%arg0: i32) -> (i32, i32) {
    %c0_i32 = arith.constant 0 : i32
    %c0_i32_0 = arith.constant 0 : i32
    %c0_i32_1 = arith.constant 0 : i32
    return %c0_i32, %c0_i32_0 : i32, i32
  }
  func.func @transform_8(%arg0: i32) -> (i32, i32) {
    %c0_i32 = arith.constant 0 : i32
    %c0_i32_0 = arith.constant 0 : i32
    %c0_i32_1 = arith.constant 0 : i32
    return %c0_i32, %c0_i32_0 : i32, i32
  }
  func.func @transform_9(%arg0: i32) -> (i32, i32) {
    %c0_i32 = arith.constant 0 : i32
    %c0_i32_0 = arith.constant 0 : i32
    %c0_i32_1 = arith.constant 0 : i32
    return %c0_i32, %c0_i32_0 : i32, i32
  }
  func.func @transform_10(%arg0: i32) -> (i32, i32) {
    %c0_i32 = arith.constant 0 : i32
    %c0_i32_0 = arith.constant 0 : i32
    %c0_i32_1 = arith.constant 0 : i32
    return %c0_i32, %c0_i32_0 : i32, i32
  }
}

</mosaic_0001>

<bundles_post_ra>
// kernel: uncondition_lstm_forward.1
= control target key start
LH: loop header
LB: loop body
LE: loop exit
PB: predicated region body
PF: predicated region fallthrough
CT: control target
= control target key end

     0   :  { %vm52_vm0 = vcmask 1042432   ;;  %vm45_vm1 = vcmask 23552   ;;  %v2809_v0 = vmov 0.0|0.0   ;;  %vm2810_vm2 = vmmov 0   ;;  %s2812_s26 = smov 64   ;;  %s3331_s3 = inlined_call_operand.vmem [shape: f32[32,128], index: 3, kind: input, shape index: {}]   ;;  %s3332_s1 = inlined_call_operand.vmem [shape: f32[3,128], index: 1, kind: input, shape index: {}]   ;;  %s3333_s0 = inlined_call_operand.vmem [shape: f32[16,3], index: 0, kind: input, shape index: {}]   ;;  %s3334_s2 = inlined_call_operand.vmem [shape: f32[1,128], index: 2, kind: input, shape index: {}]   ;;  %s3335_s4 = inlined_call_operand.vmem [shape: f32[64,128], index: 4, kind: input, shape index: {}]   ;;  %s3336_s5 = inlined_call_operand.vmem [shape: f32[1,128], index: 5, kind: input, shape index: {}]   ;;  %s3337_s8 = inlined_call_operand.vmem [shape: f32[32,128], index: 8, kind: input, shape index: {}]   ;;  %s3338_s6 = inlined_call_operand.vmem [shape: f32[1,32], index: 6, kind: input, shape index: {}]   ;;  %s3339_s7 = inlined_call_operand.vmem [shape: f32[1,32], index: 7, kind: input, shape index: {}]   ;;  %s3340_s9 = inlined_call_operand.vmem [shape: f32[1,128], index: 9, kind: input, shape index: {}]   ;;  %s3341_s10 = inlined_call_operand.vmem [shape: f32[16,128], index: 10, kind: output, shape index: {}]  }
   0x1   :  { %2496 = vmatprep.subr.bf16.mxu1 %v2809_v0  ;;  %v131_v1 = vld [vmem:[%s3331_s3] sm:$0xff]  ;;  %v132_v2 = vld [vmem:[%s3331_s3 + $0x8] sm:$0xff]  ;;  %v133_v7 = vld [vmem:[%s3331_s3 + $0x10] sm:$0xff]  ;;  %v2811_v8 = vmov 0.0   ;;  %vm144_vm3 = vcmask 261120   ;;  %vm254_vm4 = vcmask 523264  }
   0x2   :  { %v37_v3 = vld [vmem:[%s3332_s1] sm:$0x7]  ;;  %v2879_v4 = vpack.c.bf16 %v132_v2, %v131_v1  ;;  %v36_v6 = vld [vmem:[%s3333_s0 + $0x8] sm:$0xff]  ;;  %2253 = vmatprep.mubr.msk.f32.mxu1 %vm2810_vm2, %v2811_v8  ;;  %v134_v9 = vld [vmem:[%s3331_s3 + $0x18] sm:$0xff]  ;;  %vm356_vm5 = vcmask 254976  }
   0x3   :  { %2240 = vmatprep.subr.msk.mxu0 %vm52_vm0, %v37_v3  ;;  %v35_v5 = vld [vmem:[%s3333_s0] sm:$0xff]  ;;  %v2900_v10 = vpack.c.bf16 %v134_v9, %v133_v7  ;;  %v136_v30 = vld [vmem:[%s3335_s4 + $0x8] sm:$0xff]  ;;  %v137_v31 = vld [vmem:[%s3335_s4 + $0x10] sm:$0xff] }
   0x4   :  { %2241 = vmatpush3.msk.msra.mxu0 %vm52_vm0, %v37_v3  ;;  %2242 = vmatprep.mubr.msk.f32.mxu0 %vm45_vm1, %v35_v5  ;;  %v2076_v11 = vld [vmem:[%s3334_s2] ss:$0 sm:$0xff]  ;;  %s2813_s2 = smov 32   ;;  %v138_v33 = vld [vmem:[%s3335_s4 + $0x18] sm:$0xff]  ;;  %v140_v36 = vld [vmem:[%s3335_s4 + $0x28] sm:$0xff] }
   0x5   :  { %2498 = vmatpush3.bf16.msra.mxu1 %v2879_v4  ;;  %2243 = vmatmul.mubr.msk.f32.vlgmr.msra.gmra.mrb[0].mxu0 %vm45_vm1, %v36_v6  ;;  %v135_v29 = vld [vmem:[%s3335_s4] sm:$0xff]  ;;  %v2943_v34 = vpack.c.bf16 %v138_v33, %v137_v31  ;;  %v141_v38 = vld [vmem:[%s3335_s4 + $0x30] sm:$0xff]  ;;  %v142_v39 = vld [vmem:[%s3335_s4 + $0x38] sm:$0xff] }
   0x6   :  { %2499 = vmatprep.subr.bf16.mxu1 %v2809_v0  ;;  %2502 = vmatprep.subr.bf16.mxu0 %v2809_v0  ;;  %v2937_v32 = vpack.c.bf16 %v136_v30, %v135_v29  ;;  %v139_v35 = vld [vmem:[%s3335_s4 + $0x20] sm:$0xff]  ;;  %v2964_v41 = vpack.c.bf16 %v142_v39, %v141_v38 }
   0x7   :  { %2272 = vmatprep.mubr.msk.f32.mxu0 %vm2810_vm2, %v2811_v8  ;;  %v2953_v37 = vpack.c.bf16 %v140_v36, %v139_v35  ;;  %v2992_v46 = vld [vmem:[%s3336_s5] ss:$0 sm:$0xff] }
   0x8   :  { %2504 = vmatpush3.bf16.msra.mxu0 %v2937_v32 }
   0x9   :  { %2501 = vmatpush3.bf16.msra.mxu1 %v2900_v10  ;;  %2505 = vmatprep.subr.bf16.mxu0 %v2809_v0 }
   0xa   :  { %2514 = vmatprep.subr.bf16.mxu1 %v2809_v0 }
   0xc   :  { %2254 = vmatmul.mubr.f32.vlgmr.msra.gmra.mrb[0].mxu1 %v2811_v8  ;;  %2507 = vmatpush3.bf16.msra.mxu0 %v2943_v34 }
   0xd   :  { %2516 = vmatpush3.bf16.msra.mxu1 %v2879_v4  ;;  %2283 = vmatprep.mubr.msk.f32.mxu1 %vm2810_vm2, %v2811_v8 }
   0xe   :  { %2517 = vmatprep.subr.bf16.mxu1 %v2809_v0  ;;  %2508 = vmatprep.subr.bf16.mxu0 %v2809_v0 }
  0x10   :  { %2510 = vmatpush3.bf16.msra.mxu0 %v2953_v37 }
  0x11   :  { %2519 = vmatpush3.bf16.msra.mxu1 %v2900_v10  ;;  %2511 = vmatprep.subr.bf16.mxu0 %v2809_v0 }
  0x12   :  { %2520 = vmatprep.subr.bf16.mxu1 %v2809_v0 }
  0x14   :  { %2513 = vmatpush3.bf16.msra.mxu0 %v2964_v41 }
  0x15   :  { %2532 = vmatprep.subr.bf16.mxu0 %v2809_v0 }
  0xd8   :  { %v2244_v12 = vpop.f32.mrb[0].mxu0 }
  0xd9   :  { %v2918_v13 = vadd.f32 %v2244_v12, %v2076_v11  ;;  %v122_v14 = vpop.f32.mrb[1].mxu0 }
  0xda   :  { %v2920_v15 = vadd.f32 %v2076_v11, %v122_v14 }
  0xdf   :  { %v214_v16 = vpop.f32.mrb[0].mxu1 }
  0xe0   :  { %v218_v17 = vadd.f32 %v214_v16, %v2920_v15  ;;  %v2255_v18 = vpop.f32.mrb[1].mxu1 }
  0xe2   :  { %2653 = vtanh.f32 %v218_v17  ;;  %v2080_v20 = vmul.f32 -1.442695, %v218_v17 }
  0xe4   :  { %2655 = vpow2.f32 %v2080_v20 }
  0xec   :  { %v2654_v19 = vpop.eup %2653 }
  0xed   :  { %228 = vrot.lane.b32.xlu0 %v2654_v19, %s2812_s26 }
  0xee   :  { %v2656_v21 = vpop.eup %2655 }
  0xef   :  { %v222_v22 = vadd.f32 1.0, %v2656_v21 }
  0xf1   :  { %2657 = vrcp.f32 %v222_v22 }
  0xfb   :  { %v2658_v23 = vpop.eup %2657 }
  0xfc   :  { %v226_v26 = vmul.f32 0.0, %v2658_v23 }
 0x15f   :  { %v229_v24 = vpop.permute.xlu0 %228 }
 0x160   :  { %v231_v25 = vmul.f32 %v2658_v23, %v229_v24 }
 0x162   :  { %233 = vrot.lane.b32.xlu0 %v231_v25, %s2813_s2 }
 0x1d4   :  { %v234_v27 = vpop.permute.xlu0 %233 }
 0x1d5   :  { %v2925_v28 = vadd.f32 %v234_v27, %v226_v26 }
 0x1d7   :  { %2659 = vtanh.f32 %v2925_v28  ;;  %v442_v6 = vrot.slane %v2925_v28, 6 }
 0x1e1   :  { %v2660_v40 = vpop.eup %2659 }
 0x1e2   :  { %239 = vrot.lane.b32.xlu1 %v2660_v40, %s2812_s26 }
 0x254   :  { %v240_v42 = vpop.permute.xlu1 %239 }
 0x255   :  { %v242_v43 = vmul.f32 %v2658_v23, %v240_v42 }
 0x257   :  { %244 = vrot.lane.b32.xlu1 %v242_v43, %s2813_s2 }
 0x2c9   :  { %v245_v44 = vpop.permute.xlu1 %244 }
 0x2ca   :  { %v247_v45 = vsel %vm144_vm3, %v245_v44, 0.0  ;;  %2284 = vmatmul.mubr.msk.f32.vlgmr.msra.gmra.mrb[2].mxu1 %vm144_vm3, %v245_v44 }
 0x2cb   :  { %2273 = vmatmul.mubr.msk.f32.vlgmr.msra.gmra.mrb[2].mxu0 %vm254_vm4, %v247_v45  ;;  %2522 = vmatpush3.bf16.msra.mxu1 %v2937_v32 }
 0x2cc   :  { %2523 = vmatprep.subr.bf16.mxu1 %v2809_v0  ;;  %2534 = vmatpush3.bf16.msra.mxu0 %v2879_v4 }
 0x2cd   :  { %2535 = vmatprep.subr.bf16.mxu0 %v2809_v0  ;;  %2302 = vmatprep.mubr.msk.f32.mxu1 %vm2810_vm2, %v2811_v8 }
 0x2ce   :  { %2313 = vmatprep.mubr.msk.f32.mxu0 %vm2810_vm2, %v2811_v8 }
 0x2cf   :  { %2525 = vmatpush3.bf16.msra.mxu1 %v2943_v34 }
 0x2d0   :  { %2526 = vmatprep.subr.bf16.mxu1 %v2809_v0  ;;  %2537 = vmatpush3.bf16.msra.mxu0 %v2900_v10 }
 0x2d1   :  { %2538 = vmatprep.subr.bf16.mxu0 %v2809_v0 }
 0x2d3   :  { %2528 = vmatpush3.bf16.msra.mxu1 %v2953_v37 }
 0x2d4   :  { %2529 = vmatprep.subr.bf16.mxu1 %v2809_v0 }
 0x2d7   :  { %2531 = vmatpush3.bf16.msra.mxu1 %v2964_v41 }
 0x2d8   :  { %2550 = vmatprep.subr.bf16.mxu1 %v2809_v0 }
 0x39d   :  { %v426_v47 = vpop.f32.mrb[2].mxu1 }
 0x39e   :  { %v431_v48 = vrot.slane %v426_v47, 6  ;;  %v324_v49 = vpop.f32.mrb[2].mxu0  ;;  %v2285_v50 = vpop.f32.mrb[3].mxu1 }
 0x39f   :  { %v325_v51 = vadd.f32 %v2992_v46, %v324_v49  ;;  %v2274_v52 = vpop.f32.mrb[3].mxu0 }
 0x3a0   :  { %v433_v53 = vadd.f32 %v431_v48, %v2920_v15 }
 0x3a1   :  { %2661 = vtanh.f32 %v325_v51  ;;  %v2083_v56 = vmul.f32 -1.442695, %v325_v51 }
 0x3a2   :  { %2663 = vtanh.f32 %v433_v53  ;;  %v2085_v57 = vmul.f32 -1.442695, %v433_v53 }
 0x3a3   :  { %2665 = vpow2.f32 %v2083_v56 }
 0x3a4   :  { %2667 = vpow2.f32 %v2085_v57 }
 0x3ab   :  { %v2662_v54 = vpop.eup %2661 }
 0x3ac   :  { %v2664_v55 = vpop.eup %2663  ;;  %337 = vrot.lane.b32.xlu0 %v2662_v54, %s2812_s26 }
 0x3ad   :  { %446 = vrot.lane.b32.xlu1 %v2664_v55, %s2812_s26  ;;  %v2666_v58 = vpop.eup %2665 }
 0x3ae   :  { %v2668_v59 = vpop.eup %2667  ;;  %v331_v60 = vadd.f32 1.0, %v2666_v58 }
 0x3af   :  { %v437_v61 = vadd.f32 1.0, %v2668_v59 }
 0x3b0   :  { %2669 = vrcp.f32 %v331_v60 }
 0x3b1   :  { %2671 = vrcp.f32 %v437_v61 }
 0x3ba   :  { %v2670_v62 = vpop.eup %2669 }
 0x3bb   :  { %v2672_v1 = vpop.eup %2671  ;;  %v335_v7 = vmul.f32 0.0, %v2670_v62 }
 0x3bc   :  { %v444_v11 = vmul.f32 %v2672_v1, %v442_v6 }
 0x41e   :  { %v338_v63 = vpop.permute.xlu0 %337 }
 0x41f   :  { %v340_v2 = vmul.f32 %v2670_v62, %v338_v63  ;;  %v447_v3 = vpop.permute.xlu1 %446 }
 0x420   :  { %v449_v5 = vmul.f32 %v2672_v1, %v447_v3 }
 0x421   :  { %342 = vrot.lane.b32.xlu0 %v340_v2, %s2813_s2 }
 0x422   :  { %451 = vrot.lane.b32.xlu1 %v449_v5, %s2813_s2 }
 0x493   :  { %v343_v9 = vpop.permute.xlu0 %342 }
 0x494   :  { %v3001_v12 = vadd.f32 %v343_v9, %v335_v7  ;;  %v452_v14 = vpop.permute.xlu1 %451 }
 0x495   :  { %v3003_v16 = vadd.f32 %v452_v14, %v444_v11 }
 0x496   :  { %2673 = vtanh.f32 %v3001_v12 }
 0x497   :  { %2675 = vtanh.f32 %v3003_v16  ;;  %v660_v57 = vrot.slane %v3003_v16, 6 }
 0x4a0   :  { %v2674_v17 = vpop.eup %2673 }
 0x4a1   :  { %v2676_v18 = vpop.eup %2675  ;;  %348 = vrot.lane.b32.xlu0 %v2674_v17, %s2812_s26 }
 0x4a2   :  { %457 = vrot.lane.b32.xlu1 %v2676_v18, %s2812_s26 }
 0x513   :  { %v349_v19 = vpop.permute.xlu0 %348 }
 0x514   :  { %v3009_v20 = vmul.f32 %v2670_v62, %v349_v19  ;;  %v458_v21 = vpop.permute.xlu1 %457 }
 0x515   :  { %v460_v22 = vmul.f32 %v2672_v1, %v458_v21 }
 0x516   :  { %v465_v23 = vrot.slane %v3009_v20, 6 }
 0x517   :  { %462 = vrot.lane.b32.xlu0 %v460_v22, %s2813_s2  ;;  %v573_v24 = vrot.slane %v460_v22, 2 }
 0x518   :  { %466 = vrot.lane.b32.xlu1 %v465_v23, %s2812_s26 }
 0x51b   :  { %574 = vrot.lane.b32.xlu0 %v573_v24, %s2813_s2 }
 0x589   :  { %v463_v25 = vpop.permute.xlu0 %462 }
 0x58a   :  { %v467_v26 = vpop.permute.xlu1 %466 }
 0x58b   :  { %v469_v27 = vsel %vm144_vm3, %v463_v25, %v467_v26 }
 0x58c   :  { %v471_v28 = vrot.slane %v469_v27, 2 }
 0x58d   :  { %v575_v29 = vpop.permute.xlu0 %574 }
 0x58e   :  { %2303 = vmatmul.mubr.msk.f32.vlgmr.msra.gmra.mrb[4].mxu1 %vm254_vm4, %v471_v28  ;;  %2314 = vmatmul.mubr.msk.f32.vlgmr.msra.gmra.mrb[4].mxu0 %vm144_vm3, %v575_v29 }
 0x58f   :  { %2540 = vmatpush3.bf16.msra.mxu0 %v2937_v32  ;;  %2552 = vmatpush3.bf16.msra.mxu1 %v2879_v4 }
 0x590   :  { %2541 = vmatprep.subr.bf16.mxu0 %v2809_v0  ;;  %2553 = vmatprep.subr.bf16.mxu1 %v2809_v0 }
 0x591   :  { %2332 = vmatprep.mubr.msk.f32.mxu0 %vm2810_vm2, %v2811_v8  ;;  %2343 = vmatprep.mubr.msk.f32.mxu1 %vm2810_vm2, %v2811_v8 }
 0x593   :  { %2543 = vmatpush3.bf16.msra.mxu0 %v2943_v34  ;;  %2555 = vmatpush3.bf16.msra.mxu1 %v2900_v10 }
 0x594   :  { %2544 = vmatprep.subr.bf16.mxu0 %v2809_v0  ;;  %2556 = vmatprep.subr.bf16.mxu1 %v2809_v0 }
 0x597   :  { %2546 = vmatpush3.bf16.msra.mxu0 %v2953_v37 }
 0x598   :  { %2547 = vmatprep.subr.bf16.mxu0 %v2809_v0 }
 0x59b   :  { %2549 = vmatpush3.bf16.msra.mxu0 %v2964_v41 }
 0x59c   :  { %2568 = vmatprep.subr.bf16.mxu0 %v2809_v0 }
 0x661   :  { %v540_v30 = vpop.f32.mrb[4].mxu1  ;;  %v644_v31 = vpop.f32.mrb[4].mxu0 }
 0x662   :  { %v541_v33 = vadd.f32 %v2992_v46, %v540_v30  ;;  %v649_v35 = vrot.slane %v644_v31, 4  ;;  %v2304_v36 = vpop.f32.mrb[5].mxu1  ;;  %v2315_v38 = vpop.f32.mrb[5].mxu0 }
 0x664   :  { %2677 = vtanh.f32 %v541_v33  ;;  %v651_v39 = vadd.f32 %v649_v35, %v2920_v15  ;;  %v2087_v43 = vmul.f32 -1.442695, %v541_v33 }
 0x666   :  { %2679 = vtanh.f32 %v651_v39  ;;  %v2089_v44 = vmul.f32 -1.442695, %v651_v39 }
 0x667   :  { %2681 = vpow2.f32 %v2087_v43 }
 0x668   :  { %2683 = vpow2.f32 %v2089_v44 }
 0x66e   :  { %v2678_v40 = vpop.eup %2677 }
 0x66f   :  { %553 = vrot.lane.b32.xlu1 %v2678_v40, %s2812_s26 }
 0x670   :  { %v2680_v42 = vpop.eup %2679 }
 0x671   :  { %664 = vrot.lane.b32.xlu0 %v2680_v42, %s2812_s26  ;;  %v2682_v45 = vpop.eup %2681 }
 0x672   :  { %v2684_v47 = vpop.eup %2683  ;;  %v547_v48 = vadd.f32 1.0, %v2682_v45 }
 0x673   :  { %v655_v49 = vadd.f32 1.0, %v2684_v47 }
 0x674   :  { %2685 = vrcp.f32 %v547_v48 }
 0x675   :  { %2687 = vrcp.f32 %v655_v49 }
 0x67e   :  { %v2686_v50 = vpop.eup %2685 }
 0x67f   :  { %v2688_v53 = vpop.eup %2687  ;;  %v551_v56 = vmul.f32 %v2686_v50, %v3001_v12 }
 0x680   :  { %v662_v60 = vmul.f32 %v2688_v53, %v660_v57 }
 0x6e1   :  { %v554_v51 = vpop.permute.xlu1 %553 }
 0x6e2   :  { %v556_v52 = vmul.f32 %v2686_v50, %v554_v51 }
 0x6e3   :  { %v665_v54 = vpop.permute.xlu0 %664 }
 0x6e4   :  { %558 = vrot.lane.b32.xlu1 %v556_v52, %s2813_s2  ;;  %v667_v55 = vmul.f32 %v2688_v53, %v665_v54 }
 0x6e6   :  { %669 = vrot.lane.b32.xlu0 %v667_v55, %s2813_s2 }
 0x756   :  { %v559_v58 = vpop.permute.xlu1 %558 }
 0x757   :  { %v3042_v59 = vadd.f32 %v559_v58, %v551_v56 }
 0x758   :  { %v670_v61 = vpop.permute.xlu0 %669 }
 0x759   :  { %2689 = vtanh.f32 %v3042_v59  ;;  %v3045_v62 = vadd.f32 %v670_v61, %v662_v60 }
 0x75b   :  { %2691 = vtanh.f32 %v3045_v62  ;;  %v878_v44 = vrot.slane %v3045_v62, 6 }
 0x763   :  { %v2690_v63 = vpop.eup %2689 }
 0x764   :  { %564 = vrot.lane.b32.xlu1 %v2690_v63, %s2812_s26 }
 0x765   :  { %v2692_v1 = vpop.eup %2691 }
 0x766   :  { %675 = vrot.lane.b32.xlu0 %v2692_v1, %s2812_s26 }
 0x7d6   :  { %v565_v2 = vpop.permute.xlu1 %564 }
 0x7d7   :  { %v3050_v3 = vmul.f32 %v2686_v50, %v565_v2 }
 0x7d8   :  { %v676_v6 = vpop.permute.xlu0 %675 }
 0x7d9   :  { %v683_v5 = vrot.slane %v3050_v3, 4  ;;  %v678_v7 = vmul.f32 %v2688_v53, %v676_v6 }
 0x7db   :  { %684 = vrot.lane.b32.xlu0 %v683_v5, %s2812_s26  ;;  %680 = vrot.lane.b32.xlu1 %v678_v7, %s2813_s2  ;;  %v791_v9 = vrot.slane %v678_v7, 4 }
 0x7df   :  { %792 = vrot.lane.b32.xlu1 %v791_v9, %s2813_s2 }
 0x84d   :  { %v685_v11 = vpop.permute.xlu0 %684  ;;  %v681_v12 = vpop.permute.xlu1 %680 }
 0x84e   :  { %v687_v14 = vsel %vm144_vm3, %v681_v12, %v685_v11 }
 0x84f   :  { %v689_v16 = vrot.slane %v687_v14, 4 }
 0x851   :  { %v793_v17 = vpop.permute.xlu1 %792  ;;  %2333 = vmatmul.mubr.msk.f32.vlgmr.msra.gmra.mrb[6].mxu0 %vm254_vm4, %v689_v16 }
 0x852   :  { %2344 = vmatmul.mubr.msk.f32.vlgmr.msra.gmra.mrb[6].mxu1 %vm144_vm3, %v793_v17  ;;  %2570 = vmatpush3.bf16.msra.mxu0 %v2879_v4 }
 0x853   :  { %2558 = vmatpush3.bf16.msra.mxu1 %v2937_v32  ;;  %2571 = vmatprep.subr.bf16.mxu0 %v2809_v0 }
 0x854   :  { %2559 = vmatprep.subr.bf16.mxu1 %v2809_v0  ;;  %2362 = vmatprep.mubr.msk.f32.mxu1 %vm2810_vm2, %v2811_v8 }
 0x855   :  { %2373 = vmatprep.mubr.msk.f32.mxu0 %vm2810_vm2, %v2811_v8 }
 0x856   :  { %2573 = vmatpush3.bf16.msra.mxu0 %v2900_v10 }
 0x857   :  { %2561 = vmatpush3.bf16.msra.mxu1 %v2943_v34  ;;  %2574 = vmatprep.subr.bf16.mxu0 %v2809_v0 }
 0x858   :  { %2562 = vmatprep.subr.bf16.mxu1 %v2809_v0 }
 0x85b   :  { %2564 = vmatpush3.bf16.msra.mxu1 %v2953_v37 }
 0x85c   :  { %2565 = vmatprep.subr.bf16.mxu1 %v2809_v0 }
 0x85f   :  { %2567 = vmatpush3.bf16.msra.mxu1 %v2964_v41 }
 0x860   :  { %2586 = vmatprep.subr.bf16.mxu1 %v2809_v0 }
 0x924   :  { %v758_v18 = vpop.f32.mrb[6].mxu0 }
 0x925   :  { %v759_v19 = vadd.f32 %v2992_v46, %v758_v18  ;;  %v2334_v21 = vpop.f32.mrb[7].mxu0  ;;  %v862_v22 = vpop.f32.mrb[6].mxu1 }
 0x926   :  { %v867_v23 = vrot.slane %v862_v22, 2  ;;  %v2345_v24 = vpop.f32.mrb[7].mxu1 }
 0x927   :  { %2693 = vtanh.f32 %v759_v19  ;;  %v2091_v28 = vmul.f32 -1.442695, %v759_v19 }
 0x928   :  { %v869_v25 = vadd.f32 %v867_v23, %v2920_v15 }
 0x92a   :  { %2695 = vtanh.f32 %v869_v25  ;;  %v2093_v29 = vmul.f32 -1.442695, %v869_v25 }
 0x92b   :  { %2697 = vpow2.f32 %v2091_v28 }
 0x92c   :  { %2699 = vpow2.f32 %v2093_v29 }
 0x931   :  { %v2694_v26 = vpop.eup %2693 }
 0x932   :  { %771 = vrot.lane.b32.xlu0 %v2694_v26, %s2812_s26 }
 0x934   :  { %v2696_v27 = vpop.eup %2695 }
 0x935   :  { %882 = vrot.lane.b32.xlu1 %v2696_v27, %s2812_s26  ;;  %v2698_v30 = vpop.eup %2697 }
 0x936   :  { %v2700_v31 = vpop.eup %2699  ;;  %v765_v33 = vadd.f32 1.0, %v2698_v30 }
 0x937   :  { %v873_v35 = vadd.f32 1.0, %v2700_v31 }
 0x938   :  { %2701 = vrcp.f32 %v765_v33 }
 0x939   :  { %2703 = vrcp.f32 %v873_v35 }
 0x942   :  { %v2702_v36 = vpop.eup %2701 }
 0x943   :  { %v2704_v39 = vpop.eup %2703  ;;  %v769_v43 = vmul.f32 %v2702_v36, %v3042_v59 }
 0x944   :  { %v880_v48 = vmul.f32 %v2704_v39, %v878_v44 }
 0x9a4   :  { %v772_v38 = vpop.permute.xlu0 %771 }
 0x9a5   :  { %v774_v15 = vmul.f32 %v2702_v36, %v772_v38 }
 0x9a7   :  { %v883_v40 = vpop.permute.xlu1 %882  ;;  %776 = vrot.lane.b32.xlu0 %v774_v15, %s2813_s2 }
 0x9a8   :  { %v885_v42 = vmul.f32 %v2704_v39, %v883_v40 }
 0x9aa   :  { %887 = vrot.lane.b32.xlu1 %v885_v42, %s2813_s2 }
 0xa19   :  { %v777_v45 = vpop.permute.xlu0 %776 }
 0xa1a   :  { %v3083_v47 = vadd.f32 %v777_v45, %v769_v43 }
 0xa1c   :  { %2705 = vtanh.f32 %v3083_v47  ;;  %v888_v49 = vpop.permute.xlu1 %887 }
 0xa1d   :  { %v3086_v50 = vadd.f32 %v888_v49, %v880_v48 }
 0xa1f   :  { %2707 = vtanh.f32 %v3086_v50  ;;  %v1093_v28 = vrot.slane %v3086_v50, 6 }
 0xa26   :  { %v2706_v51 = vpop.eup %2705 }
 0xa27   :  { %782 = vrot.lane.b32.xlu0 %v2706_v51, %s2812_s26 }
 0xa29   :  { %v2708_v52 = vpop.eup %2707 }
 0xa2a   :  { %893 = vrot.lane.b32.xlu1 %v2708_v52, %s2812_s26 }
 0xa99   :  { %v783_v53 = vpop.permute.xlu0 %782 }
 0xa9a   :  { %v3091_v54 = vmul.f32 %v2702_v36, %v783_v53 }
 0xa9c   :  { %v901_v55 = vrot.slane %v3091_v54, 2  ;;  %v894_v56 = vpop.permute.xlu1 %893 }
 0xa9d   :  { %v896_v57 = vmul.f32 %v2704_v39, %v894_v56 }
 0xa9e   :  { %902 = vrot.lane.b32.xlu1 %v901_v55, %s2812_s26 }
 0xa9f   :  { %898 = vrot.lane.b32.xlu0 %v896_v57, %s2813_s2  ;;  %v1009_v58 = vrot.slane %v896_v57, 6 }
 0xaa3   :  { %1010 = vrot.lane.b32.xlu0 %v1009_v58, %s2813_s2 }
 0xb10   :  { %v903_v59 = vpop.permute.xlu1 %902 }
 0xb11   :  { %v899_v60 = vpop.permute.xlu0 %898 }
 0xb12   :  { %v905_v61 = vsel %vm144_vm3, %v899_v60, %v903_v59 }
 0xb13   :  { %v907_v62 = vrot.slane %v905_v61, 6 }
 0xb15   :  { %2363 = vmatmul.mubr.msk.f32.vlgmr.msra.gmra.mrb[8].mxu1 %vm254_vm4, %v907_v62  ;;  %v1011_v63 = vpop.permute.xlu0 %1010 }
 0xb16   :  { %2374 = vmatmul.mubr.msk.f32.vlgmr.msra.gmra.mrb[8].mxu0 %vm144_vm3, %v1011_v63  ;;  %2588 = vmatpush3.bf16.msra.mxu1 %v2879_v4 }
 0xb17   :  { %2576 = vmatpush3.bf16.msra.mxu0 %v2937_v32  ;;  %2589 = vmatprep.subr.bf16.mxu1 %v2809_v0 }
 0xb18   :  { %2577 = vmatprep.subr.bf16.mxu0 %v2809_v0  ;;  %2403 = vmatprep.mubr.msk.f32.mxu1 %vm2810_vm2, %v2811_v8 }
 0xb19   :  { %2392 = vmatprep.mubr.msk.f32.mxu0 %vm2810_vm2, %v2811_v8 }
 0xb1a   :  { %2591 = vmatpush3.bf16.msra.mxu1 %v2900_v10 }
 0xb1b   :  { %2579 = vmatpush3.bf16.msra.mxu0 %v2943_v34  ;;  %2592 = vmatprep.subr.bf16.mxu1 %v2809_v0 }
 0xb1c   :  { %2580 = vmatprep.subr.bf16.mxu0 %v2809_v0 }
 0xb1f   :  { %2582 = vmatpush3.bf16.msra.mxu0 %v2953_v37 }
 0xb20   :  { %2583 = vmatprep.subr.bf16.mxu0 %v2809_v0 }
 0xb23   :  { %2585 = vmatpush3.bf16.msra.mxu0 %v2964_v41 }
 0xb24   :  { %2604 = vmatprep.subr.bf16.mxu0 %v2809_v0 }
 0xbe8   :  { %v976_v1 = vpop.f32.mrb[8].mxu1 }
 0xbe9   :  { %v977_v2 = vadd.f32 %v2992_v46, %v976_v1  ;;  %v2364_v5 = vpop.f32.mrb[9].mxu1  ;;  %v1080_v6 = vpop.f32.mrb[8].mxu0 }
 0xbea   :  { %v1084_v7 = vadd.f32 %v1080_v6, %v2918_v13  ;;  %v2375_v9 = vpop.f32.mrb[9].mxu0 }
 0xbeb   :  { %2709 = vtanh.f32 %v977_v2  ;;  %v2095_v14 = vmul.f32 -1.442695, %v977_v2 }
 0xbec   :  { %2711 = vtanh.f32 %v1084_v7  ;;  %v2097_v16 = vmul.f32 -1.442695, %v1084_v7 }
 0xbed   :  { %2713 = vpow2.f32 %v2095_v14 }
 0xbee   :  { %2715 = vpow2.f32 %v2097_v16 }
 0xbf5   :  { %v2710_v11 = vpop.eup %2709 }
 0xbf6   :  { %v2712_v12 = vpop.eup %2711  ;;  %989 = vrot.lane.b32.xlu1 %v2710_v11, %s2812_s26 }
 0xbf7   :  { %1097 = vrot.lane.b32.xlu0 %v2712_v12, %s2812_s26  ;;  %v2714_v17 = vpop.eup %2713 }
 0xbf8   :  { %v2716_v18 = vpop.eup %2715  ;;  %v983_v19 = vadd.f32 1.0, %v2714_v17 }
 0xbf9   :  { %v1088_v21 = vadd.f32 1.0, %v2716_v18 }
 0xbfa   :  { %2717 = vrcp.f32 %v983_v19 }
 0xbfb   :  { %2719 = vrcp.f32 %v1088_v21 }
 0xc04   :  { %v2718_v22 = vpop.eup %2717 }
 0xc05   :  { %v2720_v24 = vpop.eup %2719  ;;  %v987_v29 = vmul.f32 %v2718_v22, %v3083_v47 }
 0xc06   :  { %v1095_v31 = vmul.f32 %v2720_v24, %v1093_v28 }
 0xc68   :  { %v990_v23 = vpop.permute.xlu1 %989 }
 0xc69   :  { %v992_v25 = vmul.f32 %v2718_v22, %v990_v23  ;;  %v1098_v26 = vpop.permute.xlu0 %1097 }
 0xc6a   :  { %v1100_v27 = vmul.f32 %v2720_v24, %v1098_v26 }
 0xc6b   :  { %994 = vrot.lane.b32.xlu1 %v992_v25, %s2813_s2 }
 0xc6c   :  { %1102 = vrot.lane.b32.xlu0 %v1100_v27, %s2813_s2 }
 0xcdd   :  { %v995_v30 = vpop.permute.xlu1 %994 }
 0xcde   :  { %v3124_v33 = vadd.f32 %v995_v30, %v987_v29  ;;  %v1103_v35 = vpop.permute.xlu0 %1102 }
 0xcdf   :  { %v3126_v36 = vadd.f32 %v1103_v35, %v1095_v31 }
 0xce0   :  { %2721 = vtanh.f32 %v3124_v33 }
 0xce1   :  { %2723 = vtanh.f32 %v3126_v36  ;;  %v1306_v11 = vrot.slane %v3126_v36, 6 }
 0xcea   :  { %v2722_v38 = vpop.eup %2721 }
 0xceb   :  { %v2724_v15 = vpop.eup %2723  ;;  %1000 = vrot.lane.b32.xlu1 %v2722_v38, %s2812_s26 }
 0xcec   :  { %1108 = vrot.lane.b32.xlu0 %v2724_v15, %s2812_s26 }
 0xd5d   :  { %v1001_v39 = vpop.permute.xlu1 %1000 }
 0xd5e   :  { %v3132_v40 = vmul.f32 %v2718_v22, %v1001_v39  ;;  %v1109_v42 = vpop.permute.xlu0 %1108 }
 0xd5f   :  { %v1111_v43 = vmul.f32 %v2720_v24, %v1109_v42 }
 0xd60   :  { %1116 = vrot.lane.b32.xlu0 %v3132_v40, %s2812_s26 }
 0xd61   :  { %1113 = vrot.lane.b32.xlu1 %v1111_v43, %s2813_s2 }
 0xdd2   :  { %v1117_v44 = vpop.permute.xlu0 %1116 }
 0xdd3   :  { %v1114_v45 = vpop.permute.xlu1 %1113 }
 0xdd4   :  { %v1119_v47 = vsel %vm144_vm3, %v1114_v45, %v1117_v44  ;;  %2404 = vmatmul.mubr.msk.f32.vlgmr.msra.gmra.mrb[10].mxu1 %vm144_vm3, %v1114_v45 }
 0xdd5   :  { %2393 = vmatmul.mubr.msk.f32.vlgmr.msra.gmra.mrb[10].mxu0 %vm254_vm4, %v1119_v47  ;;  %2594 = vmatpush3.bf16.msra.mxu1 %v2937_v32 }
 0xdd6   :  { %2595 = vmatprep.subr.bf16.mxu1 %v2809_v0  ;;  %2606 = vmatpush3.bf16.msra.mxu0 %v2879_v4 }
 0xdd7   :  { %2607 = vmatprep.subr.bf16.mxu0 %v2809_v0  ;;  %2422 = vmatprep.mubr.msk.f32.mxu1 %vm2810_vm2, %v2811_v8 }
 0xdd8   :  { %2433 = vmatprep.mubr.msk.f32.mxu0 %vm2810_vm2, %v2811_v8 }
 0xdd9   :  { %2597 = vmatpush3.bf16.msra.mxu1 %v2943_v34 }
 0xdda   :  { %2598 = vmatprep.subr.bf16.mxu1 %v2809_v0  ;;  %2609 = vmatpush3.bf16.msra.mxu0 %v2900_v10 }
 0xddb   :  { %2610 = vmatprep.subr.bf16.mxu0 %v2809_v0 }
 0xddd   :  { %2600 = vmatpush3.bf16.msra.mxu1 %v2953_v37 }
 0xdde   :  { %2601 = vmatprep.subr.bf16.mxu1 %v2809_v0 }
 0xde1   :  { %2603 = vmatpush3.bf16.msra.mxu1 %v2964_v41 }
 0xde2   :  { %2622 = vmatprep.subr.bf16.mxu1 %v2809_v0 }
 0xea7   :  { %v1290_v48 = vpop.f32.mrb[10].mxu1 }
 0xea8   :  { %v1295_v49 = vrot.slane %v1290_v48, 6  ;;  %v1189_v50 = vpop.f32.mrb[10].mxu0  ;;  %v2405_v51 = vpop.f32.mrb[11].mxu1 }
 0xea9   :  { %v1190_v52 = vadd.f32 %v2992_v46, %v1189_v50  ;;  %v2394_v53 = vpop.f32.mrb[11].mxu0 }
 0xeaa   :  { %v1297_v55 = vadd.f32 %v1295_v49, %v2918_v13 }
 0xeab   :  { %2725 = vtanh.f32 %v1190_v52  ;;  %v2099_v58 = vmul.f32 -1.442695, %v1190_v52 }
 0xeac   :  { %2727 = vtanh.f32 %v1297_v55  ;;  %v2101_v59 = vmul.f32 -1.442695, %v1297_v55 }
 0xead   :  { %2729 = vpow2.f32 %v2099_v58 }
 0xeae   :  { %2731 = vpow2.f32 %v2101_v59 }
 0xeb5   :  { %v2726_v56 = vpop.eup %2725 }
 0xeb6   :  { %v2728_v57 = vpop.eup %2727  ;;  %1202 = vrot.lane.b32.xlu1 %v2726_v56, %s2812_s26 }
 0xeb7   :  { %1310 = vrot.lane.b32.xlu0 %v2728_v57, %s2812_s26  ;;  %v2730_v60 = vpop.eup %2729 }
 0xeb8   :  { %v2732_v61 = vpop.eup %2731  ;;  %v1196_v62 = vadd.f32 1.0, %v2730_v60 }
 0xeb9   :  { %v1301_v63 = vadd.f32 1.0, %v2732_v61 }
 0xeba   :  { %2733 = vrcp.f32 %v1196_v62 }
 0xebb   :  { %2735 = vrcp.f32 %v1301_v63 }
 0xec4   :  { %v2734_v1 = vpop.eup %2733 }
 0xec5   :  { %v2736_v5 = vpop.eup %2735  ;;  %v1200_v12 = vmul.f32 %v2734_v1, %v3124_v33 }
 0xec6   :  { %v1308_v16 = vmul.f32 %v2736_v5, %v1306_v11 }
 0xf28   :  { %v1203_v2 = vpop.permute.xlu1 %1202 }
 0xf29   :  { %v1205_v6 = vmul.f32 %v2734_v1, %v1203_v2  ;;  %v1311_v7 = vpop.permute.xlu0 %1310 }
 0xf2a   :  { %v1313_v9 = vmul.f32 %v2736_v5, %v1311_v7 }
 0xf2b   :  { %1207 = vrot.lane.b32.xlu1 %v1205_v6, %s2813_s2 }
 0xf2c   :  { %1315 = vrot.lane.b32.xlu0 %v1313_v9, %s2813_s2 }
 0xf9d   :  { %v1208_v14 = vpop.permute.xlu1 %1207 }
 0xf9e   :  { %v3164_v17 = vadd.f32 %v1208_v14, %v1200_v12  ;;  %v1316_v18 = vpop.permute.xlu0 %1315 }
 0xf9f   :  { %v3166_v19 = vadd.f32 %v1316_v18, %v1308_v16 }
 0xfa0   :  { %2737 = vtanh.f32 %v3164_v17 }
 0xfa1   :  { %2739 = vtanh.f32 %v3166_v19  ;;  %v1524_v60 = vrot.slane %v3166_v19, 6 }
 0xfaa   :  { %v2738_v21 = vpop.eup %2737 }
 0xfab   :  { %v2740_v22 = vpop.eup %2739  ;;  %1213 = vrot.lane.b32.xlu1 %v2738_v21, %s2812_s26 }
 0xfac   :  { %1321 = vrot.lane.b32.xlu0 %v2740_v22, %s2812_s26 }
0x101d   :  { %v1214_v23 = vpop.permute.xlu1 %1213 }
0x101e   :  { %v3172_v24 = vmul.f32 %v2734_v1, %v1214_v23  ;;  %v1322_v25 = vpop.permute.xlu0 %1321 }
0x101f   :  { %v1324_v26 = vmul.f32 %v2736_v5, %v1322_v25 }
0x1020   :  { %v1329_v27 = vrot.slane %v3172_v24, 6 }
0x1021   :  { %1326 = vrot.lane.b32.xlu1 %v1324_v26, %s2813_s2  ;;  %v1437_v28 = vrot.slane %v1324_v26, 2 }
0x1022   :  { %1330 = vrot.lane.b32.xlu0 %v1329_v27, %s2812_s26 }
0x1025   :  { %1438 = vrot.lane.b32.xlu1 %v1437_v28, %s2813_s2 }
0x1093   :  { %v1327_v29 = vpop.permute.xlu1 %1326 }
0x1094   :  { %v1331_v30 = vpop.permute.xlu0 %1330 }
0x1095   :  { %v1333_v31 = vsel %vm144_vm3, %v1327_v29, %v1331_v30 }
0x1096   :  { %v1335_v33 = vrot.slane %v1333_v31, 2 }
0x1097   :  { %v1439_v35 = vpop.permute.xlu1 %1438 }
0x1098   :  { %2423 = vmatmul.mubr.msk.f32.vlgmr.msra.gmra.mrb[12].mxu1 %vm254_vm4, %v1335_v33  ;;  %2434 = vmatmul.mubr.msk.f32.vlgmr.msra.gmra.mrb[12].mxu0 %vm144_vm3, %v1439_v35 }
0x1099   :  { %2612 = vmatpush3.bf16.msra.mxu0 %v2937_v32  ;;  %2624 = vmatpush3.bf16.msra.mxu1 %v2879_v4 }
0x109a   :  { %2613 = vmatprep.subr.bf16.mxu0 %v2809_v0  ;;  %2625 = vmatprep.subr.bf16.mxu1 %v2809_v0 }
0x109b   :  { %2452 = vmatprep.mubr.msk.f32.mxu0 %vm2810_vm2, %v2811_v8  ;;  %2463 = vmatprep.mubr.msk.f32.mxu1 %vm2810_vm2, %v2811_v8 }
0x109d   :  { %2615 = vmatpush3.bf16.msra.mxu0 %v2943_v34  ;;  %2627 = vmatpush3.bf16.msra.mxu1 %v2900_v10 }
0x109e   :  { %2616 = vmatprep.subr.bf16.mxu0 %v2809_v0  ;;  %2628 = vmatprep.subr.bf16.mxu1 %v2809_v0 }
0x10a1   :  { %2618 = vmatpush3.bf16.msra.mxu0 %v2953_v37 }
0x10a2   :  { %2619 = vmatprep.subr.bf16.mxu0 %v2809_v0 }
0x10a5   :  { %2621 = vmatpush3.bf16.msra.mxu0 %v2964_v41 }
0x116b   :  { %v1404_v4 = vpop.f32.mrb[12].mxu1  ;;  %v1508_v36 = vpop.f32.mrb[12].mxu0 }
0x116c   :  { %v1405_v38 = vadd.f32 %v2992_v46, %v1404_v4  ;;  %v1513_v15 = vrot.slane %v1508_v36, 4  ;;  %v2424_v39 = vpop.f32.mrb[13].mxu1  ;;  %v2435_v42 = vpop.f32.mrb[13].mxu0 }
0x116e   :  { %2741 = vtanh.f32 %v1405_v38  ;;  %v1515_v10 = vadd.f32 %v1513_v15, %v2918_v13  ;;  %v2103_v45 = vmul.f32 -1.442695, %v1405_v38 }
0x1170   :  { %2743 = vtanh.f32 %v1515_v10  ;;  %v2105_v47 = vmul.f32 -1.442695, %v1515_v10 }
0x1171   :  { %2745 = vpow2.f32 %v2103_v45 }
0x1172   :  { %2747 = vpow2.f32 %v2105_v47 }
0x1178   :  { %v2742_v43 = vpop.eup %2741 }
0x1179   :  { %1417 = vrot.lane.b32.xlu0 %v2742_v43, %s2812_s26 }
0x117a   :  { %v2744_v44 = vpop.eup %2743 }
0x117b   :  { %1528 = vrot.lane.b32.xlu1 %v2744_v44, %s2812_s26  ;;  %v2746_v48 = vpop.eup %2745 }
0x117c   :  { %v2748_v49 = vpop.eup %2747  ;;  %v1411_v50 = vadd.f32 1.0, %v2746_v48 }
0x117d   :  { %v1519_v51 = vadd.f32 1.0, %v2748_v49 }
0x117e   :  { %2749 = vrcp.f32 %v1411_v50 }
0x117f   :  { %2751 = vrcp.f32 %v1519_v51 }
0x1188   :  { %v2750_v52 = vpop.eup %2749 }
0x1189   :  { %v2752_v56 = vpop.eup %2751  ;;  %v1415_v59 = vmul.f32 %v2750_v52, %v3164_v17 }
0x118a   :  { %v1526_v63 = vmul.f32 %v2752_v56, %v1524_v60 }
0x11eb   :  { %v1418_v53 = vpop.permute.xlu0 %1417 }
0x11ec   :  { %v1420_v55 = vmul.f32 %v2750_v52, %v1418_v53 }
0x11ed   :  { %v1529_v57 = vpop.permute.xlu1 %1528 }
0x11ee   :  { %1422 = vrot.lane.b32.xlu0 %v1420_v55, %s2813_s2  ;;  %v1531_v58 = vmul.f32 %v2752_v56, %v1529_v57 }
0x11f0   :  { %1533 = vrot.lane.b32.xlu1 %v1531_v58, %s2813_s2 }
0x1260   :  { %v1423_v61 = vpop.permute.xlu0 %1422 }
0x1261   :  { %v3204_v62 = vadd.f32 %v1423_v61, %v1415_v59 }
0x1262   :  { %v1534_v1 = vpop.permute.xlu1 %1533 }
0x1263   :  { %2753 = vtanh.f32 %v3204_v62  ;;  %v3207_v2 = vadd.f32 %v1534_v1, %v1526_v63 }
0x1265   :  { %2755 = vtanh.f32 %v3207_v2  ;;  %v1742_v42 = vrot.slane %v3207_v2, 6 }
0x126d   :  { %v2754_v5 = vpop.eup %2753 }
0x126e   :  { %1428 = vrot.lane.b32.xlu0 %v2754_v5, %s2812_s26 }
0x126f   :  { %v2756_v6 = vpop.eup %2755 }
0x1270   :  { %1539 = vrot.lane.b32.xlu1 %v2756_v6, %s2812_s26 }
0x12e0   :  { %v1429_v7 = vpop.permute.xlu0 %1428 }
0x12e1   :  { %v3212_v9 = vmul.f32 %v2750_v52, %v1429_v7 }
0x12e2   :  { %v1540_v12 = vpop.permute.xlu1 %1539 }
0x12e3   :  { %v1547_v11 = vrot.slane %v3212_v9, 4  ;;  %v1542_v14 = vmul.f32 %v2752_v56, %v1540_v12 }
0x12e5   :  { %1548 = vrot.lane.b32.xlu1 %v1547_v11, %s2812_s26  ;;  %1544 = vrot.lane.b32.xlu0 %v1542_v14, %s2813_s2  ;;  %v1655_v16 = vrot.slane %v1542_v14, 4 }
0x12e9   :  { %1656 = vrot.lane.b32.xlu0 %v1655_v16, %s2813_s2 }
0x1357   :  { %v1549_v17 = vpop.permute.xlu1 %1548  ;;  %v1545_v18 = vpop.permute.xlu0 %1544 }
0x1358   :  { %v1551_v19 = vsel %vm144_vm3, %v1545_v18, %v1549_v17 }
0x1359   :  { %v1553_v21 = vrot.slane %v1551_v19, 4 }
0x135b   :  { %v1657_v22 = vpop.permute.xlu0 %1656  ;;  %2453 = vmatmul.mubr.msk.f32.vlgmr.msra.gmra.mrb[14].mxu0 %vm254_vm4, %v1553_v21 }
0x135c   :  { %2464 = vmatmul.mubr.msk.f32.vlgmr.msra.gmra.mrb[14].mxu1 %vm144_vm3, %v1657_v22 }
0x135d   :  { %2630 = vmatpush3.bf16.msra.mxu1 %v2937_v32  ;;  %2482 = vmatprep.mubr.msk.f32.mxu1 %vm2810_vm2, %v2811_v8 }
0x135e   :  { %2631 = vmatprep.subr.bf16.mxu1 %v2809_v0 }
0x1361   :  { %2633 = vmatpush3.bf16.msra.mxu1 %v2943_v34 }
0x1362   :  { %2634 = vmatprep.subr.bf16.mxu1 %v2809_v0 }
0x1365   :  { %2636 = vmatpush3.bf16.msra.mxu1 %v2953_v37 }
0x1366   :  { %2637 = vmatprep.subr.bf16.mxu1 %v2809_v0 }
0x1369   :  { %2639 = vmatpush3.bf16.msra.mxu1 %v2964_v41 }
0x142e   :  { %v1622_v23 = vpop.f32.mrb[14].mxu0 }
0x142f   :  { %v1623_v25 = vadd.f32 %v2992_v46, %v1622_v23  ;;  %v2454_v26 = vpop.f32.mrb[15].mxu0  ;;  %v1726_v32 = vpop.f32.mrb[14].mxu1 }
0x1430   :  { %v1731_v27 = vrot.slane %v1726_v32, 2  ;;  %v2465_v28 = vpop.f32.mrb[15].mxu1 }
0x1431   :  { %2757 = vtanh.f32 %v1623_v25  ;;  %v2107_v0 = vmul.f32 -1.442695, %v1623_v25 }
0x1432   :  { %v1733_v8 = vadd.f32 %v1731_v27, %v2918_v13 }
0x1434   :  { %2759 = vtanh.f32 %v1733_v8  ;;  %v2109_v37 = vmul.f32 -1.442695, %v1733_v8 }
0x1435   :  { %2761 = vpow2.f32 %v2107_v0 }
0x1436   :  { %2763 = vpow2.f32 %v2109_v37 }
0x143b   :  { %v2758_v34 = vpop.eup %2757 }
0x143c   :  { %1635 = vrot.lane.b32.xlu1 %v2758_v34, %s2812_s26 }
0x143e   :  { %v2760_v29 = vpop.eup %2759 }
0x143f   :  { %1746 = vrot.lane.b32.xlu0 %v2760_v29, %s2812_s26  ;;  %v2762_v41 = vpop.eup %2761 }
0x1440   :  { %v2764_v30 = vpop.eup %2763  ;;  %v1629_v31 = vadd.f32 1.0, %v2762_v41 }
0x1441   :  { %v1737_v33 = vadd.f32 1.0, %v2764_v30 }
0x1442   :  { %2765 = vrcp.f32 %v1629_v31  ;;  %v1920_v31 = vld [vmem:[%s3337_s8] sm:$0xff] }
0x1443   :  { %2767 = vrcp.f32 %v1737_v33  ;;  %v1921_v33 = vld [vmem:[%s3337_s8 + $0x8] sm:$0xff] }
0x144c   :  { %v2766_v35 = vpop.eup %2765 }
0x144d   :  { %v2768_v36 = vpop.eup %2767  ;;  %v1633_v39 = vmul.f32 %v2766_v35, %v3204_v62 }
0x144e   :  { %v1744_v44 = vmul.f32 %v2768_v36, %v1742_v42 }
0x14ae   :  { %v1636_v4 = vpop.permute.xlu1 %1635 }
0x14af   :  { %v1638_v13 = vmul.f32 %v2766_v35, %v1636_v4  ;;  %v1922_v4 = vld [vmem:[%s3337_s8 + $0x10] sm:$0xff] }
0x14b1   :  { %v1747_v38 = vpop.permute.xlu0 %1746  ;;  %1640 = vrot.lane.b32.xlu1 %v1638_v13, %s2813_s2  ;;  %v1923_v13 = vld [vmem:[%s3337_s8 + $0x18] sm:$0xff] }
0x14b2   :  { %v1749_v15 = vmul.f32 %v2768_v36, %v1747_v38 }
0x14b4   :  { %1751 = vrot.lane.b32.xlu0 %v1749_v15, %s2813_s2 }
0x1523   :  { %v1641_v10 = vpop.permute.xlu1 %1640 }
0x1524   :  { %v1643_v43 = vadd.f32 %v1641_v10, %v1633_v39  ;;  %v2112_v10 = vld [vmem:[%s3338_s6] ss:$0 sm:$0xff] }
0x1526   :  { %2769 = vtanh.f32 %v1643_v43  ;;  %v1752_v45 = vpop.permute.xlu0 %1751 }
0x1527   :  { %v1754_v47 = vadd.f32 %v1752_v45, %v1744_v44  ;;  %v2113_v44 = vld [vmem:[%s3339_s7] ss:$0 sm:$0xff] }
0x1529   :  { %2771 = vtanh.f32 %v1754_v47 }
0x1530   :  { %v2770_v48 = vpop.eup %2769 }
0x1531   :  { %1646 = vrot.lane.b32.xlu1 %v2770_v48, %s2812_s26 }
0x1533   :  { %v2772_v49 = vpop.eup %2771 }
0x1534   :  { %1757 = vrot.lane.b32.xlu0 %v2772_v49, %s2812_s26 }
0x15a3   :  { %v1647_v50 = vpop.permute.xlu1 %1646 }
0x15a4   :  { %v1649_v51 = vmul.f32 %v2766_v35, %v1647_v50  ;;  %v2640_v35 = vpack.c.bf16 %v1921_v33, %v1920_v31 }
0x15a6   :  { %v1765_v52 = vrot.slane %v1649_v51, 2  ;;  %v1758_v53 = vpop.permute.xlu0 %1757  ;;  %2641 = vmatprep.subr.bf16.mxu0 %v2640_v35 }
0x15a7   :  { %v1760_v55 = vmul.f32 %v2768_v36, %v1758_v53  ;;  %2643 = vmatpush3.bf16.msra.mxu0 %v2640_v35  ;;  %v2644_v36 = vpack.c.bf16 %v1923_v13, %v1922_v4 }
0x15a8   :  { %1766 = vrot.lane.b32.xlu0 %v1765_v52, %s2812_s26 }
0x15a9   :  { %1762 = vrot.lane.b32.xlu1 %v1760_v55, %s2813_s2  ;;  %2645 = vmatprep.subr.bf16.mxu0 %v2644_v36 }
0x15ab   :  { %2647 = vmatpush3.bf16.msra.mxu0 %v2644_v36 }
0x161a   :  { %v1767_v56 = vpop.permute.xlu0 %1766 }
0x161b   :  { %v1763_v57 = vpop.permute.xlu1 %1762 }
0x161c   :  { %v1769_v58 = vsel %vm144_vm3, %v1763_v57, %v1767_v56  ;;  %v2012_v56 = vlaneseq }
0x161d   :  { %v1771_v59 = vrot.slane %v1769_v58, 6  ;;  %v2114_v58 = vld [vmem:[%s3340_s9] ss:$0 sm:$0xff] }
0x161e   :  { %v3294_v57 = vand.u32 127, %v2012_v56 }
0x161f   :  { %2483 = vmatmul.mubr.msk.f32.vlgmr.msra.gmra.mrb[16].mxu1 %vm254_vm4, %v1771_v59 }
0x1620   :  { %vm2014_vm6 = vcmp.lt.s32.totalorder %v3294_v57, 5  ;;  %vm2057_vm7 = vcmp.ge.s32.totalorder %v3294_v57, 15  ;;  %vm2058_vm8 = vcmp.lt.s32.totalorder %v3294_v57, 25  ;;  %vm2062_vm9 = vcmp.ge.s32.totalorder %v3294_v57, 25 }
0x1621   :  { %vm2063_vm10 = vcmp.lt.s32.totalorder %v3294_v57, 30  ;;  %vm3312_vm11 = vmand %vm2057_vm7, %vm2058_vm8  ;;  %vm2067_vm13 = vcmp.ge.s32.totalorder %v3294_v57, 30 }
0x1622   :  { %vm2064_vm12 = vmand %vm2062_vm9, %vm2063_vm10 }
0x16f2   :  { %v1840_v60 = vpop.f32.mrb[16].mxu1 }
0x16f3   :  { %v1841_v61 = vadd.f32 %v2992_v46, %v1840_v60  ;;  %v2484_v62 = vpop.f32.mrb[17].mxu1 }
0x16f5   :  { %2773 = vtanh.f32 %v1841_v61  ;;  %v2111_v1 = vmul.f32 -1.442695, %v1841_v61 }
0x16f7   :  { %2775 = vpow2.f32 %v2111_v1 }
0x16ff   :  { %v2774_v63 = vpop.eup %2773 }
0x1700   :  { %1853 = vrot.lane.b32.xlu1 %v2774_v63, %s2812_s26 }
0x1701   :  { %v2776_v2 = vpop.eup %2775 }
0x1702   :  { %v1847_v5 = vadd.f32 1.0, %v2776_v2 }
0x1704   :  { %2777 = vrcp.f32 %v1847_v5 }
0x170e   :  { %v2778_v6 = vpop.eup %2777 }
0x170f   :  { %v1851_v46 = vmul.f32 %v2778_v6, %v1643_v43 }
0x1772   :  { %v1854_v7 = vpop.permute.xlu1 %1853 }
0x1773   :  { %v1856_v11 = vmul.f32 %v2778_v6, %v1854_v7 }
0x1775   :  { %1858 = vrot.lane.b32.xlu0 %v1856_v11, %s2813_s2 }
0x1779   :  { %353 = vrot.lane.b32.xlu0 %v3009_v20, %s2813_s2 }
0x177d   :  { %787 = vrot.lane.b32.xlu0 %v3091_v54, %s2813_s2 }
0x1781   :  { %1218 = vrot.lane.b32.xlu0 %v3172_v24, %s2813_s2 }
0x1785   :  { %1651 = vrot.lane.b32.xlu0 %v1649_v51, %s2813_s2 }
0x17e7   :  { %v1859_v12 = vpop.permute.xlu0 %1858 }
0x17e8   :  { %v1861_v14 = vadd.f32 %v1859_v12, %v1851_v46 }
0x17ea   :  { %2779 = vtanh.f32 %v1861_v14 }
0x17eb   :  { %v354_v16 = vpop.permute.xlu0 %353 }
0x17ec   :  { %357 = vst.msk [vmem:[#allocation2] sm:$0x3] %vm356_vm5, %v354_v16 }
0x17ef   :  { %v788_v17 = vpop.permute.xlu0 %787 }
0x17f0   :  { %790 = vst.msk [vmem:[#allocation2 + $0x4] sm:$0x3] %vm356_vm5, %v788_v17 }
0x17f3   :  { %v1219_v20 = vpop.permute.xlu0 %1218 }
0x17f4   :  { %v2780_v18 = vpop.eup %2779  ;;  %1221 = vst.msk [vmem:[#allocation2 + $0x8] sm:$0x3] %vm356_vm5, %v1219_v20 }
0x17f5   :  { %1864 = vrot.lane.b32.xlu1 %v2780_v18, %s2812_s26 }
0x17f7   :  { %v1652_v54 = vpop.permute.xlu0 %1651 }
0x17f8   :  { %1654 = vst.msk [vmem:[#allocation2 + $0xc] sm:$0x3] %vm356_vm5, %v1652_v54 }
0x17f9   :  { %569 = vrot.lane.b32.xlu1 %v3050_v3, %s2813_s2 }
0x17fd   :  { %1005 = vrot.lane.b32.xlu1 %v3132_v40, %s2813_s2 }
0x1801   :  { %1433 = vrot.lane.b32.xlu1 %v3212_v9, %s2813_s2 }
0x1867   :  { %v1865_v24 = vpop.permute.xlu1 %1864 }
0x1868   :  { %v1867_v19 = vmul.f32 %v2778_v6, %v1865_v24 }
0x186a   :  { %1869 = vrot.lane.b32.xlu1 %v1867_v19, %s2813_s2 }
0x186b   :  { %v570_v21 = vpop.permute.xlu1 %569 }
0x186c   :  { %572 = vst.msk [vmem:[#allocation2 + $0x2] sm:$0x3] %vm356_vm5, %v570_v21 }
0x186f   :  { %v1006_v22 = vpop.permute.xlu1 %1005 }
0x1870   :  { %1008 = vst.msk [vmem:[#allocation2 + $0x6] sm:$0x3] %vm356_vm5, %v1006_v22 }
0x1873   :  { %v1434_v23 = vpop.permute.xlu1 %1433 }
0x1874   :  { %1436 = vst.msk [vmem:[#allocation2 + $0xa] sm:$0x3] %vm356_vm5, %v1434_v23 }
0x1877   :  { %v1873_v3 = vld [vmem:[#allocation2] sm:$0xff] }
0x1878   :  { %v1875_v25 = vsel %vm144_vm3, %v1873_v3, 0.0 }
0x1879   :  { %1876 = vadd.xlane.f32.xlu0 %v1875_v25 }
0x18dc   :  { %v1870_v40 = vpop.permute.xlu1 %1869 }
0x18dd   :  { %1872 = vst.msk [vmem:[#allocation2 + $0xe] sm:$0x3] %vm356_vm5, %v1870_v40 }
0x18e4   :  { %v1874_v9 = vld [vmem:[#allocation2 + $0x8] sm:$0xff] }
0x18e5   :  { %v1878_v26 = vsel %vm144_vm3, %v1874_v9, 0.0 }
0x18e6   :  { %1879 = vadd.xlane.f32.xlu1 %v1878_v26 }
0x1906   :  { %v1877_v32 = vpop.xlane.xlu0 %1876 }
0x1907   :  { %v1882_v27 = vmul.f32 0.03125, %v1877_v32 }
0x1909   :  { %v1884_v28 = vsub.f32 %v1873_v3, %v1882_v27 }
0x190b   :  { %v1886_v8 = vmul.f32 %v1884_v28, %v1884_v28 }
0x190d   :  { %v1888_v34 = vsel %vm144_vm3, %v1886_v8, 0.0 }
0x190e   :  { %1889 = vadd.xlane.f32.xlu0 %v1888_v34 }
0x1973   :  { %v1880_v29 = vpop.xlane.xlu1 %1879 }
0x1974   :  { %v1883_v0 = vmul.f32 0.03125, %v1880_v29 }
0x1976   :  { %v1885_v37 = vsub.f32 %v1874_v9, %v1883_v0 }
0x1978   :  { %v1887_v41 = vmul.f32 %v1885_v37, %v1885_v37 }
0x197a   :  { %v1891_v30 = vsel %vm144_vm3, %v1887_v41, 0.0 }
0x197b   :  { %1892 = vadd.xlane.f32.xlu0 %v1891_v30 }
0x199b   :  { %v1890_v38 = vpop.xlane.xlu0 %1889 }
0x199c   :  { %v1894_v15 = vmul.f32 0.03125, %v1890_v38 }
0x199e   :  { %v1896_v39 = vadd.f32 1e-05, %v1894_v15 }
0x19a0   :  { %2781 = vrsqrt.f32 %v1896_v39 }
0x19aa   :  { %v2782_v42 = vpop.eup %2781 }
0x19ab   :  { %v1900_v43 = vmul.f32 %v2782_v42, %v1884_v28 }
0x19ad   :  { %v1909_v45 = vmul.f32 %v2112_v10, %v1900_v43 }
0x19af   :  { %v1918_v47 = vadd.f32 %v2113_v44, %v1909_v45 }
0x19b1   :  { %2493 = vmatprep.mubr.msk.f32.mxu0 %vm144_vm3, %v1918_v47 }
0x1a08   :  { %v1893_v48 = vpop.xlane.xlu0 %1892 }
0x1a09   :  { %v1895_v49 = vmul.f32 0.03125, %v1893_v48 }
0x1a0b   :  { %v1897_v50 = vadd.f32 1e-05, %v1895_v49 }
0x1a0d   :  { %2783 = vrsqrt.f32 %v1897_v50 }
0x1a17   :  { %v2784_v51 = vpop.eup %2783 }
0x1a18   :  { %v1901_v52 = vmul.f32 %v2784_v51, %v1885_v37 }
0x1a1a   :  { %v1910_v53 = vmul.f32 %v2112_v10, %v1901_v52 }
0x1a1c   :  { %v1919_v55 = vadd.f32 %v2113_v44, %v1910_v53 }
0x1a1e   :  { %2494 = vmatmul.mubr.msk.f32.vlgmr.msra.gmra.mrb[16].mxu0 %vm144_vm3, %v1919_v55 }
0x1af1   :  { %v2495_v59 = vpop.f32.mrb[16].mxu0 }
0x1af2   :  { %v2009_v60 = vadd.f32 %v2495_v59, %v2114_v58  ;;  %v2003_v61 = vpop.f32.mrb[17].mxu0 }
0x1af3   :  { %v2004_v62 = vadd.f32 %v2114_v58, %v2003_v61 }
0x1af4   :  { %v2016_v63 = vsel %vm2014_vm6, %v2009_v60, -1e+30  ;;  %v2118_v20 = vmul.f32 -1.442695, %v2009_v60  ;;  %v2039_v19 = vmul.f32 1.442695, %v2009_v60 }
0x1af5   :  { %2019 = vmax.xlane.f32.xlu0 %v2016_v63  ;;  %v2015_v1 = vsel %vm2014_vm6, %v2004_v62, -1e+30  ;;  %v2117_v18 = vmul.f32 -1.442695, %v2004_v62  ;;  %v2037_v22 = vmul.f32 1.442695, %v2004_v62 }
0x1af6   :  { %2017 = vmax.xlane.f32.xlu1 %v2015_v1 }
0x1b82   :  { %v2020_v2 = vpop.xlane.xlu0 %2019 }
0x1b83   :  { %v2022_v5 = vsub.f32 %v2009_v60, %v2020_v2  ;;  %v2018_v6 = vpop.xlane.xlu1 %2017 }
0x1b84   :  { %v2021_v7 = vsub.f32 %v2004_v62, %v2018_v6 }
0x1b85   :  { %v2025_v11 = vmul.f32 1.442695, %v2022_v5 }
0x1b86   :  { %v2023_v46 = vmul.f32 1.442695, %v2021_v7 }
0x1b87   :  { %2785 = vpow2.f32 %v2025_v11 }
0x1b88   :  { %2787 = vpow2.f32 %v2023_v46 }
0x1b89   :  { %2789 = vpow2.f32 %v2118_v20 }
0x1b8a   :  { %2791 = vpow2.f32 %v2117_v18 }
0x1b8b   :  { %2793 = vtanh.f32 %v2009_v60 }
0x1b91   :  { %v2786_v12 = vpop.eup %2785 }
0x1b92   :  { %v2788_v14 = vpop.eup %2787  ;;  %v2028_v16 = vsel %vm2014_vm6, %v2786_v12, 0.0 }
0x1b93   :  { %2031 = vadd.xlane.f32.xlu0 %v2028_v16  ;;  %v2027_v17 = vsel %vm2014_vm6, %v2788_v14, 0.0  ;;  %v2790_v54 = vpop.eup %2789 }
0x1b94   :  { %2029 = vadd.xlane.f32.xlu1 %v2027_v17  ;;  %v2792_v24 = vpop.eup %2791  ;;  %v2050_v3 = vadd.f32 1.0, %v2790_v54 }
0x1b95   :  { %v2049_v25 = vadd.f32 1.0, %v2792_v24  ;;  %v2794_v40 = vpop.eup %2793 }
0x1c20   :  { %v2032_v21 = vpop.xlane.xlu0 %2031 }
0x1c21   :  { %2795 = vrcp.f32 %v2032_v21  ;;  %v2030_v23 = vpop.xlane.xlu1 %2029 }
0x1c22   :  { %2797 = vrcp.f32 %v2030_v23 }
0x1c23   :  { %2799 = vtanh.f32 %v2004_v62 }
0x1c24   :  { %2801 = vpow2.f32 %v2039_v19 }
0x1c25   :  { %2803 = vpow2.f32 %v2037_v22 }
0x1c26   :  { %2805 = vrcp.f32 %v2050_v3 }
0x1c27   :  { %2807 = vrcp.f32 %v2049_v25 }
0x1c2b   :  { %v2796_v9 = vpop.eup %2795 }
0x1c2c   :  { %v2798_v26 = vpop.eup %2797  ;;  %v2036_v27 = vmul.f32 %v2796_v9, %v2028_v16 }
0x1c2d   :  { %v2800_v28 = vpop.eup %2799  ;;  %v2034_v8 = vmul.f32 %v2798_v26, %v2027_v17 }
0x1c2e   :  { %v2802_v34 = vpop.eup %2801  ;;  %v2056_v29 = vsel %vm2014_vm6, %v2036_v27, %v2009_v60 }
0x1c2f   :  { %v2804_v0 = vpop.eup %2803  ;;  %v2061_v37 = vsel %vm3312_vm11, %v2802_v34, %v2056_v29  ;;  %v2055_v41 = vsel %vm2014_vm6, %v2034_v8, %v2004_v62 }
0x1c30   :  { %v2806_v30 = vpop.eup %2805  ;;  %v2066_v31 = vsel %vm2064_vm12, %v2794_v40, %v2061_v37  ;;  %v2060_v33 = vsel %vm3312_vm11, %v2804_v0, %v2055_v41 }
0x1c31   :  { %v2808_v35 = vpop.eup %2807  ;;  %v2069_v4 = vsel %vm2067_vm13, %v2806_v30, %v2066_v31  ;;  %v2065_v13 = vsel %vm2064_vm12, %v2800_v28, %v2060_v33 }
0x1c32   :  { %2071 = vst [vmem:[%s3341_s10 + $0x8] sm:$0xff] %v2069_v4  ;;  %v2068_v36 = vsel %vm2067_vm13, %v2808_v35, %v2065_v13 }
0x1c33   :  { %2070 = vst [vmem:[%s3341_s10] sm:$0xff] %v2068_v36 }

</bundles_post_ra>
